<compile_context>
chip_gen: v7x
topology: tpu7x:2x2x1
jax: 0.10.0
libtpu: 0.0.40
codegen_flags: <defaults>
</compile_context>

<pallas_src>
import math

import jax
import jax.numpy as jnp
from jax import lax
from jax.experimental import pallas as pl
from jax.experimental.pallas import tpu as pltpu

LANE = 128
SUB = 8
OUT_LANES = 128


def _round_up(x, m):
    return (x + m - 1) // m * m


# ---------------------------------------------------------------------------
# Parameter construction (deterministic, Xavier-uniform like torch init).
# ---------------------------------------------------------------------------
def xavier_uniform(key, shape):
    fan_out, fan_in = shape
    limit = math.sqrt(6.0 / (fan_in + fan_out))
    return jax.random.uniform(key, shape, jnp.float32, -limit, limit)


def init_params(key, r_dim, z_dim, at_dim, g_dim):
    keys = jax.random.split(key, 11)
    return {
        # torch F.linear weight layout: (out_features, in_features)
        "W_alpha": xavier_uniform(keys[0], (r_dim, 2 * r_dim)),
        "b_alpha": jnp.zeros((r_dim,), jnp.float32),
        # NOTE: W_delta / b_delta are uninitialized in the torch module's
        # reset_parameters(); initialized deterministically here.
        "W_delta": xavier_uniform(keys[1], (r_dim, 2 * r_dim)),
        "b_delta": jnp.zeros((r_dim,), jnp.float32),
        "W_q": xavier_uniform(keys[2], (at_dim, z_dim)),
        "b_q": jnp.zeros((at_dim,), jnp.float32),
        "W_k": xavier_uniform(keys[3], (at_dim, z_dim)),
        "b_k": jnp.zeros((at_dim,), jnp.float32),
        "W_v": xavier_uniform(keys[4], (at_dim, z_dim)),
        "b_v": jnp.zeros((at_dim,), jnp.float32),
        "W_z": xavier_uniform(keys[5], (z_dim, r_dim)),
        "b_z": jnp.zeros((z_dim,), jnp.float32),
        "W_f": xavier_uniform(keys[6], (at_dim, g_dim)),
        "b_f": jnp.zeros((at_dim,), jnp.float32),
        "W_EMA": xavier_uniform(keys[7], (g_dim, r_dim)),
        "b_EMA": jnp.zeros((g_dim,), jnp.float32),
        "W_z_at": xavier_uniform(keys[8], (g_dim, at_dim)),
        "b_z_at": jnp.zeros((g_dim,), jnp.float32),
        "W_i": xavier_uniform(keys[9], (1, r_dim)),
        "b_i": jnp.zeros((1,), jnp.float32),
        "W_final": xavier_uniform(keys[10], (1, g_dim)),
    }


# ---------------------------------------------------------------------------
# Static lane layout: every fused sub-output gets a 128-lane sub-slot.
# ---------------------------------------------------------------------------
def make_layout(r_dim, z_dim, at_dim, g_dim):
    rs = _round_up(r_dim, LANE)
    zs = _round_up(z_dim, LANE)
    ats = _round_up(at_dim, LANE)
    gs = _round_up(g_dim, LANE)
    widths = {
        "ad":   2 * rs,            # alpha | delta
        "rema": zs + gs + LANE,    # z_lin | ema' | i_lin
        "qkv":  3 * ats,           # q | k | v
        "f":    ats,
        "zat":  gs,
    }
    order = ["ad", "rema", "qkv", "f", "zat"]
    off, col = {}, 0
    for g in order:
        off[g] = col
        col += widths[g]
    return dict(
        rs=rs, zs=zs, as_=ats, gs=gs, off=off,
        k_rows=max(2 * rs, rs, zs, ats, gs),
        total_lanes=col,
        bias_rows={"ad": 0, "rema": 1, "qkv": 2, "f": 3, "zat": 4, "final_w": 5},
        bias_lanes=max(widths.values()),
        bias_nrows=_round_up(6, SUB),
    )


# ---------------------------------------------------------------------------
# One-time parameter packing (hoisted out of the per-call path).
#   w_pack : all weights, transposed to (in, out), each sub-output at a
#            128-lane sub-slot, bf16 (half the weight DMA / VMEM).
#   bv_pack: one row per fused bias group + a row for W_final, f32.
# Padded entries are exactly zero (required for the padded-lane invariant).
# ---------------------------------------------------------------------------
def pack_params(p, r_dim, z_dim, at_dim, g_dim, weight_dtype=jnp.bfloat16):
    L = make_layout(r_dim, z_dim, at_dim, g_dim)
    rs, zs, ats, gs = L["rs"], L["zs"], L["as_"], L["gs"]
    off, br = L["off"], L["bias_rows"]
    f32 = jnp.float32
    T = lambda name: jnp.asarray(p[name], f32).T     # (in, out)

    w = jnp.zeros((L["k_rows"], L["total_lanes"]), f32)

    def put_w(w, row, col, mat):
        kin, nout = mat.shape
        return w.at[row:row + kin, col:col + nout].set(mat)

    wa, wd = T("W_alpha"), T("W_delta")               # (2r, r)
    # contract rows: [0:r_dim] multiply r_prev slot, [rs:rs+r_dim] multiply r_cur slot
    w = put_w(w, 0, off["ad"], wa[:r_dim]);  w = put_w(w, rs, off["ad"], wa[r_dim:])
    w = put_w(w, 0, off["ad"] + rs, wd[:r_dim]); w = put_w(w, rs, off["ad"] + rs, wd[r_dim:])
    w = put_w(w, 0, off["rema"], T("W_z"))
    w = put_w(w, 0, off["rema"] + zs, T("W_EMA"))
    w = put_w(w, 0, off["rema"] + zs + gs, T("W_i"))
    w = put_w(w, 0, off["qkv"], T("W_q"))
    w = put_w(w, 0, off["qkv"] + ats, T("W_k"))
    w = put_w(w, 0, off["qkv"] + 2 * ats, T("W_v"))
    w = put_w(w, 0, off["f"], T("W_f"))
    w = put_w(w, 0, off["zat"], T("W_z_at"))
    w_pack = w.astype(weight_dtype)

    bv = jnp.zeros((L["bias_nrows"], L["bias_lanes"]), f32)

    def put_b(bv, row, col, vec):
        vec = jnp.asarray(vec, f32)
        return bv.at[row, col:col + vec.shape[0]].set(vec)

    bv = put_b(bv, br["ad"], 0, p["b_alpha"]);   bv = put_b(bv, br["ad"], rs, p["b_delta"])
    bv = put_b(bv, br["rema"], 0, p["b_z"]);     bv = put_b(bv, br["rema"], zs, p["b_EMA"])
    bv = put_b(bv, br["rema"], zs + gs, p["b_i"])
    bv = put_b(bv, br["qkv"], 0, p["b_q"]);      bv = put_b(bv, br["qkv"], ats, p["b_k"])
    bv = put_b(bv, br["qkv"], 2 * ats, p["b_v"])
    bv = put_b(bv, br["f"], 0, p["b_f"])
    bv = put_b(bv, br["zat"], 0, p["b_z_at"])
    bv = put_b(bv, br["final_w"], 0, p["W_final"][0])
    return w_pack, bv, L


def quantize_weights_like_pack(p):
    """The f32 weights the kernel effectively uses (bf16-rounded packed mats)."""
    q = dict(p)
    for n in ["W_alpha", "W_delta", "W_z", "W_EMA", "W_i",
              "W_q", "W_k", "W_v", "W_f", "W_z_at"]:
        q[n] = p[n].astype(jnp.bfloat16).astype(jnp.float32)
    return q


# ---------------------------------------------------------------------------
# Kernel + wrapper factory.
# ---------------------------------------------------------------------------
def make_mega_decoder(r_dim, z_dim, at_dim, g_dim, layout, *,
                      mxu_dtype=jnp.float32):
    f32 = jnp.float32
    rs, zs, ats, gs = layout["rs"], layout["zs"], layout["as_"], layout["gs"]
    off, brows = layout["off"], layout["bias_rows"]
    scale = 1.0 / math.sqrt(float(at_dim))
    rema_w = zs + gs + LANE

    @jax.jit
    def forward(R, w_pack, bv_pack):
        m = R.shape[0]
        m8 = _round_up(m, SUB)
        T = min(128, m8)                  # q/kv tile rows
        m_pad = _round_up(m, T)
        n = m_pad // T                    # q tiles == kv tiles
        need_mask = (m != m_pad)

        R = R.astype(f32)
        # [r_prev | r_cur] packed into two 128-lane sub-slots (padded lanes 0).
        # TODO(synk): for n == 1 the row shift could be done in-kernel with
        # pltpu.roll(axis=0) + an iota mask, removing this wrapper concat.
        r_prev = jnp.concatenate([jnp.zeros((1, r_dim), f32), R[:-1]], axis=0)
        seq = jnp.zeros((m_pad, 2 * rs), f32)
        seq = seq.at[:m, 0:r_dim].set(r_prev)
        seq = seq.at[:m, rs:rs + r_dim].set(R)

        def mm(x, w):                     # (M,K) x (K,N), f32 accumulation
            return lax.dot_general(
                x.astype(mxu_dtype), w.astype(mxu_dtype),
                dimension_numbers=(((1,), (0,)), ((), ())),
                preferred_element_type=f32)

        def mm_nt(x, y):                  # (M,K) x (N,K) -> (M,N): no k transpose
            return lax.dot_general(
                x.astype(mxu_dtype), y.astype(mxu_dtype),
                dimension_numbers=(((1,), (1,)), ((), ())),
                preferred_element_type=f32)

        def kernel(seq_q_ref, seq_k_ref, w_ref, bv_ref, out_ref,
                   q_scr, rp_scr, il_scr, m_scr, l_scr, acc_scr):
            ki = pl.program_id(1)
            bv = bv_ref[...]

            def brow(name, c0, width):
                r = brows[name]
                return bv[r:r + 1, c0:c0 + width]

            def r_ema_of(seq_tile):
                # fused EMA gates: one dot -> alpha | delta (128-lane sub-slots)
                w_ad = w_ref[0:2 * rs, off["ad"]:off["ad"] + 2 * rs]
                ad = jnp.tanh(mm(seq_tile, w_ad) + brow("ad", 0, 2 * rs))
                alpha, delta = ad[:, 0:rs], ad[:, rs:2 * rs]
                r_prev_t, r_cur_t = seq_tile[:, 0:rs], seq_tile[:, rs:2 * rs]
                return alpha * r_cur_t + (1.0 - alpha) * delta * r_prev_t

            # ---- q-side projections: once per q tile -------------------------
            @pl.when(ki == 0)
            def _():
                r_ema = r_ema_of(seq_q_ref[...])
                w_rema = w_ref[0:rs, off["rema"]:off["rema"] + rema_w]
                proj = mm(r_ema, w_rema) + brow("rema", 0, rema_w)  # z | ema' | i
                z_lin = proj[:, 0:zs]
                z = z_lin * jax.nn.sigmoid(z_lin)                   # SiLU (f32)
                w_q = w_ref[0:zs, off["qkv"]:off["qkv"] + ats]
                # 1/sqrt(at_dim) folded into q -> no (m, m) scale multiply later
                q_scr[...] = (mm(z, w_q) + brow("qkv", 0, ats)) * scale
                rp_scr[...] = proj[:, zs:zs + gs]
                il_scr[...] = proj[:, zs + gs:zs + gs + 1]
                m_scr[...] = jnp.full(m_scr.shape, -jnp.inf, f32)
                l_scr[...] = jnp.zeros(l_scr.shape, f32)
                acc_scr[...] = jnp.zeros(acc_scr.shape, f32)

            # ---- kv-side projections + online-softmax update (every ki) ------
            r_ema_k = r_ema_of(seq_k_ref[...])
            w_zl = w_ref[0:rs, off["rema"]:off["rema"] + zs]
            z_lin_k = mm(r_ema_k, w_zl) + brow("rema", 0, zs)
            z_k = z_lin_k * jax.nn.sigmoid(z_lin_k)
            w_kv = w_ref[0:zs, off["qkv"] + ats:off["qkv"] + 3 * ats]
            kv = mm(z_k, w_kv) + brow("qkv", ats, 2 * ats)          # k | v
            k_t, v_t = kv[:, 0:ats], kv[:, ats:2 * ats]

            scores = mm_nt(q_scr[...], k_t)                         # (T, T)
            if need_mask:                                           # static branch
                col = ki * T + lax.broadcasted_iota(jnp.int32, scores.shape, 1)
                scores = jnp.where(col < m, scores, -1e30)
            m_prev = m_scr[...]
            m_new = jnp.maximum(m_prev, jnp.max(scores, axis=-1, keepdims=True))
            a = jnp.exp(m_prev - m_new)
            p = jnp.exp(scores - m_new)
            l_scr[...] = a * l_scr[...] + jnp.sum(p, axis=-1, keepdims=True)
            acc_scr[...] = a * acc_scr[...] + mm(p, v_t)
            m_scr[...] = m_new

            # ---- finalize: gating + lane-dense output store -------------------
            @pl.when(ki == n - 1)
            def _():
                # exact reciprocal (per review: approx not needed / hurts parity)
                z_at = acc_scr[...] * pl.reciprocal(l_scr[...], approx=False)
                rp = rp_scr[...]
                w_f = w_ref[0:gs, off["f"]:off["f"] + ats]
                f_gate = jax.nn.sigmoid(mm(rp, w_f) + brow("f", 0, ats))
                z_at_p = f_gate * z_at                              # pad lanes: 0.5*0=0
                w_zat = w_ref[0:ats, off["zat"]:off["zat"] + gs]
                z_ema_f = mm(z_at_p, w_zat) + brow("zat", 0, gs)
                z_triple = jnp.tanh(rp + z_ema_f)
                i_gate = jnp.tanh(il_scr[...])                      # (T, 1)
                z_final = i_gate * z_triple + (1.0 - i_gate) * rp
                w_fin = brow("final_w", 0, gs)                      # (1, gs)
                p_hat = jax.nn.sigmoid(
                    jnp.sum(z_final * w_fin, axis=-1, keepdims=True))
                out_ref[...] = jnp.broadcast_to(p_hat, out_ref.shape).astype(out_ref.dtype)

        # ---- VMEM budget / cost estimate ------------------------------------
        w_bytes = w_pack.size * w_pack.dtype.itemsize
        bv_bytes = bv_pack.size * bv_pack.dtype.itemsize
        buf_bytes = (2 * w_bytes + 2 * bv_bytes
                     + 4 * T * 2 * rs * 4            # seq_q + seq_k, double-buffered
                     + 2 * T * OUT_LANES * 4         # output block
                     + (2 * T * ats + T * gs + 3 * T * LANE) * 4   # scratch
                     + 4 * T * T * 4)                # (T, T) temporaries
        vmem_limit = int(min(64 << 20, max(32 << 20, 4 * buf_bytes)))

        per_kv = 2 * T * (4 * rs * rs + rs * zs + 2 * zs * ats) + 4 * T * T * ats
        per_q = 2 * T * (4 * rs * rs + rs * rema_w + zs * ats
                         + gs * ats + ats * gs + gs)
        flops = n * n * per_kv + n * per_q
        transc = n * n * T * (2 * rs + zs + T) + n * T * (2 * rs + zs + ats + 2 * gs + 1)
        bytes_acc = int(w_bytes + bv_bytes + 2 * m_pad * 2 * rs * 4
                        + m_pad * OUT_LANES * 4)

        out = pl.pallas_call(
            kernel,
            out_shape=jax.ShapeDtypeStruct((m_pad, OUT_LANES), f32),
            grid_spec=pltpu.PrefetchScalarGridSpec(
                num_scalar_prefetch=0,
                grid=(n, n),                                       # (q tiles, kv tiles)
                in_specs=[
                    pl.BlockSpec((T, 2 * rs), lambda qi, ki: (qi, 0)),   # q-side rows
                    pl.BlockSpec((T, 2 * rs), lambda qi, ki: (ki, 0)),   # kv-side rows
                    pl.BlockSpec(w_pack.shape, lambda qi, ki: (0, 0)),   # weights resident
                    pl.BlockSpec(bv_pack.shape, lambda qi, ki: (0, 0)),  # biases resident
                ],
                out_specs=pl.BlockSpec((T, OUT_LANES), lambda qi, ki: (qi, 0)),
                scratch_shapes=[
                    pltpu.VMEM((T, ats), f32),   # q (pre-scaled)
                    pltpu.VMEM((T, gs), f32),    # r_ema'
                    pltpu.VMEM((T, 1), f32),     # i_lin
                    pltpu.VMEM((T, 1), f32),     # m_i
                    pltpu.VMEM((T, 1), f32),     # l_i
                    pltpu.VMEM((T, ats), f32),   # attention accumulator
                ]),
            compiler_params=pltpu.CompilerParams(
                dimension_semantics=("parallel", "arbitrary"),
                vmem_limit_bytes=vmem_limit),
            cost_estimate=pl.CostEstimate(
                flops=int(flops), transcendentals=int(transc),
                bytes_accessed=bytes_acc),
        )(seq, seq, w_pack, bv_pack)
        return out[:m, :1]                                          # (m, 1)

    return forward


# ---------------------------------------------------------------------------
# Pure-JAX reference (mirrors the torch forward).
# ---------------------------------------------------------------------------
def mega_decoder_reference(R, p, r_dim, at_dim):
    R = R.astype(jnp.float32)
    Rz = jnp.concatenate([jnp.zeros((1, r_dim), jnp.float32), R], axis=0)
    r_t, r_p = Rz[1:], Rz[:-1]
    concat_r = jnp.concatenate([r_p, r_t], axis=1)
    lin = lambda x, W, b=None: x @ W.T + (0.0 if b is None else b)
    alpha = jnp.tanh(lin(concat_r, p["W_alpha"], p["b_alpha"]))
    delta = jnp.tanh(lin(concat_r, p["W_delta"], p["b_delta"]))
    r_ema = alpha * r_t + (1 - alpha) * delta * r_p
    z = jax.nn.silu(lin(r_ema, p["W_z"], p["b_z"]))
    Q = lin(z, p["W_q"], p["b_q"])
    K = lin(z, p["W_k"], p["b_k"])
    V = lin(z, p["W_v"], p["b_v"])
    attn = jax.nn.softmax(Q @ K.T / jnp.sqrt(jnp.float32(at_dim)), axis=-1)
    z_at = attn @ V
    r_ema_p = lin(r_ema, p["W_EMA"], p["b_EMA"])
    f = jax.nn.sigmoid(lin(r_ema_p, p["W_f"], p["b_f"]))
    z_ema_f = lin(f * z_at, p["W_z_at"], p["b_z_at"])
    z_tp = jnp.tanh(r_ema_p + z_ema_f)
    i = jnp.tanh(lin(r_ema, p["W_i"], p["b_i"]))
    z_final = i * z_tp + (1 - i) * r_ema_p
    return jax.nn.sigmoid(lin(z_final, p["W_final"]))


if __name__ == "__main__":
    # Small, module-consistent sizes.
    r_dim, r_size, z_dim, at_dim, f_dim, g_dim = 32, 16, 32, 32, 32, 32
    m = 8  # sequence length

    key = jax.random.PRNGKey(0)
    k_param, k_input = jax.random.split(key)
    params = init_params(k_param, r_dim, z_dim, at_dim, g_dim)
    R = jax.random.normal(k_input, (m, r_dim), jnp.float32)

    # One-time packing (hoisted out of the per-call path); weights in bf16.
    w_pack, bv_pack, layout = pack_params(params, r_dim, z_dim, at_dim, g_dim,
                                          weight_dtype=jnp.bfloat16)

    # Reference computed with the exact (bf16-rounded) weights the kernel holds,
    # isolating kernel correctness from the deliberate weight quantization.
    params_q = quantize_weights_like_pack(params)
    ref = mega_decoder_reference(R, params_q, r_dim, at_dim)

    # High-fidelity mode: bf16 weights, f32 MXU operands / accumulation.
    forward = make_mega_decoder(r_dim, z_dim, at_dim, g_dim, layout,
                                mxu_dtype=jnp.float32)
    out = jax.block_until_ready(forward(R, w_pack, bv_pack))
    assert out.shape == (m, 1)
    assert bool(jnp.all(jnp.isfinite(out)))
    assert jnp.allclose(out, ref, atol=1e-2, rtol=1e-2), (out, ref)

    # Full bf16-MXU mode (recommended on v6e/v7x): activations cast to bf16 at
    # every dot, f32 accumulation, elementwise math stays f32. Loose sanity bound.
    forward_bf16 = make_mega_decoder(r_dim, z_dim, at_dim, g_dim, layout,
                                     mxu_dtype=jnp.bfloat16)
    out_bf16 = jax.block_until_ready(forward_bf16(R, w_pack, bv_pack))
    assert out_bf16.shape == (m, 1)
    assert bool(jnp.all(jnp.isfinite(out_bf16)))
    assert jnp.allclose(out_bf16, ref, atol=1e-1, rtol=0.0)

    print("KERNEL_OK")
</pallas_src>

<mosaic_0001>
module attributes {stable_mosaic.version = 11 : i64} {
  func.func @kernel(%arg0: i32, %arg1: i32, %arg2: memref<8x256xf32, #tpu.memory_space<vmem>>, %arg3: memref<8x256xf32, #tpu.memory_space<vmem>>, %arg4: memref<256x1280xbf16, #tpu.memory_space<vmem>>, %arg5: memref<8x384xf32, #tpu.memory_space<vmem>>, %arg6: memref<8x128xf32, #tpu.memory_space<vmem>>, %arg7: memref<8x128xf32, #tpu.memory_space<vmem>>, %arg8: memref<8x128xf32, #tpu.memory_space<vmem>>, %arg9: memref<8x1xf32, #tpu.memory_space<vmem>>, %arg10: memref<8x1xf32, #tpu.memory_space<vmem>>, %arg11: memref<8x1xf32, #tpu.memory_space<vmem>>, %arg12: memref<8x128xf32, #tpu.memory_space<vmem>>) attributes {dimension_semantics = [#tpu.dimension_semantics<parallel>, #tpu.dimension_semantics<arbitrary>], iteration_bounds = array<i64: 1, 1>, scalar_prefetch = 0 : i64, scratch_operands = 6 : i64, tpu.core_type = #tpu.core_type<tc>, window_params = [{transform_indices = @transform_0, window_bounds = array<i64: 8, 256>}, {transform_indices = @transform_1, window_bounds = array<i64: 8, 256>}, {pipeline_mode = #tpu.pipeline_mode<synchronous>, transform_indices = @transform_2, window_bounds = array<i64: 256, 1280>}, {pipeline_mode = #tpu.pipeline_mode<synchronous>, transform_indices = @transform_3, window_bounds = array<i64: 8, 384>}, {transform_indices = @transform_4, window_bounds = array<i64: 8, 128>}]} {
    %c0 = arith.constant 0 : index
    %c0_0 = arith.constant 0 : index
    %0 = vector.load %arg5[%c0, %c0_0] : memref<8x384xf32, #tpu.memory_space<vmem>>, vector<8x384xf32>
    %c0_i32 = arith.constant 0 : i32
    %1 = arith.cmpi eq, %arg1, %c0_i32 : i32
    %2 = arith.extui %1 : i1 to i32
    %c0_i32_1 = arith.constant 0 : i32
    %3 = arith.cmpi ne, %2, %c0_i32_1 : i32
    scf.if %3 {
      %c0_32 = arith.constant 0 : index
      %c0_33 = arith.constant 0 : index
      %69 = vector.load %arg2[%c0_32, %c0_33] : memref<8x256xf32, #tpu.memory_space<vmem>>, vector<8x256xf32>
      %c0_34 = arith.constant 0 : index
      %c0_35 = arith.constant 0 : index
      %70 = vector.load %arg4[%c0_34, %c0_35] : memref<256x1280xbf16, #tpu.memory_space<vmem>>, vector<256x256xbf16>
      %71 = arith.extf %70 : vector<256x256xbf16> to vector<256x256xf32>
      %cst_36 = arith.constant dense<0.000000e+00> : vector<8x256xf32>
      %72 = tpu.matmul %69, %71, %cst_36 {dimension_numbers = #tpu.dot_dimension_numbers<[1], [0], [0], [1], [0, 0, 1, 1], [], []>} : vector<8x256xf32>, vector<256x256xf32>, vector<8x256xf32> -> vector<8x256xf32>
      %73 = vector.extract_strided_slice %0 {offsets = [0, 0], sizes = [1, 256], strides = [1, 1]} : vector<8x384xf32> to vector<1x256xf32>
      %74 = vector.broadcast %73 : vector<1x256xf32> to vector<8x256xf32>
      %75 = arith.addf %72, %74 : vector<8x256xf32>
      %76 = math.tanh %75 : vector<8x256xf32>
      %77 = vector.extract_strided_slice %76 {offsets = [0, 0], sizes = [8, 128], strides = [1, 1]} : vector<8x256xf32> to vector<8x128xf32>
      %78 = vector.extract_strided_slice %76 {offsets = [0, 128], sizes = [8, 128], strides = [1, 1]} : vector<8x256xf32> to vector<8x128xf32>
      %79 = vector.extract_strided_slice %69 {offsets = [0, 0], sizes = [8, 128], strides = [1, 1]} : vector<8x256xf32> to vector<8x128xf32>
      %80 = vector.extract_strided_slice %69 {offsets = [0, 128], sizes = [8, 128], strides = [1, 1]} : vector<8x256xf32> to vector<8x128xf32>
      %81 = arith.mulf %77, %80 : vector<8x128xf32>
      %cst_37 = arith.constant 1.000000e+00 : f32
      %82 = vector.broadcast %cst_37 : f32 to vector<8x128xf32>
      %83 = arith.subf %82, %77 : vector<8x128xf32>
      %84 = arith.mulf %83, %78 : vector<8x128xf32>
      %85 = arith.mulf %84, %79 : vector<8x128xf32>
      %86 = arith.addf %81, %85 : vector<8x128xf32>
      %c0_38 = arith.constant 0 : index
      %c256_39 = arith.constant 256 : index
      %87 = vector.load %arg4[%c0_38, %c256_39] : memref<256x1280xbf16, #tpu.memory_space<vmem>>, vector<128x384xbf16>
      %88 = arith.extf %87 : vector<128x384xbf16> to vector<128x384xf32>
      %cst_40 = arith.constant dense<0.000000e+00> : vector<8x384xf32>
      %89 = tpu.matmul %86, %88, %cst_40 {dimension_numbers = #tpu.dot_dimension_numbers<[1], [0], [0], [1], [0, 0, 1, 1], [], []>} : vector<8x128xf32>, vector<128x384xf32>, vector<8x384xf32> -> vector<8x384xf32>
      %90 = vector.extract_strided_slice %0 {offsets = [1, 0], sizes = [1, 384], strides = [1, 1]} : vector<8x384xf32> to vector<1x384xf32>
      %91 = vector.broadcast %90 : vector<1x384xf32> to vector<8x384xf32>
      %92 = arith.addf %89, %91 : vector<8x384xf32>
      %93 = vector.extract_strided_slice %92 {offsets = [0, 0], sizes = [8, 128], strides = [1, 1]} : vector<8x384xf32> to vector<8x128xf32>
      %94 = arith.negf %93 : vector<8x128xf32>
      %95 = math.exp %94 : vector<8x128xf32>
      %cst_41 = arith.constant 1.000000e+00 : f32
      %96 = vector.broadcast %cst_41 : f32 to vector<8x128xf32>
      %97 = arith.addf %96, %95 : vector<8x128xf32>
      %98 = arith.divf %96, %97 : vector<8x128xf32>
      %99 = arith.mulf %93, %98 : vector<8x128xf32>
      %c0_42 = arith.constant 0 : index
      %c640 = arith.constant 640 : index
      %100 = vector.load %arg4[%c0_42, %c640] : memref<256x1280xbf16, #tpu.memory_space<vmem>>, vector<128x128xbf16>
      %101 = arith.extf %100 : vector<128x128xbf16> to vector<128x128xf32>
      %cst_43 = arith.constant dense<0.000000e+00> : vector<8x128xf32>
      %102 = tpu.matmul %99, %101, %cst_43 {dimension_numbers = #tpu.dot_dimension_numbers<[1], [0], [0], [1], [0, 0, 1, 1], [], []>} : vector<8x128xf32>, vector<128x128xf32>, vector<8x128xf32> -> vector<8x128xf32>
      %103 = vector.extract_strided_slice %0 {offsets = [2, 0], sizes = [1, 128], strides = [1, 1]} : vector<8x384xf32> to vector<1x128xf32>
      %104 = vector.broadcast %103 : vector<1x128xf32> to vector<8x128xf32>
      %105 = arith.addf %102, %104 : vector<8x128xf32>
      %cst_44 = arith.constant 0.176776692 : f32
      %106 = vector.broadcast %cst_44 : f32 to vector<8x128xf32>
      %107 = arith.mulf %105, %106 : vector<8x128xf32>
      %c0_45 = arith.constant 0 : index
      %c0_46 = arith.constant 0 : index
      %108 = vector.load %arg7[%c0_45, %c0_46] : memref<8x128xf32, #tpu.memory_space<vmem>>, vector<8x128xf32>
      tpu.vector_store %arg7[%c0_45, %c0_46], %107 {strides = array<i32>} : memref<8x128xf32, #tpu.memory_space<vmem>>, vector<8x128xf32>,
      %109 = vector.extract_strided_slice %92 {offsets = [0, 128], sizes = [8, 128], strides = [1, 1]} : vector<8x384xf32> to vector<8x128xf32>
      %c0_47 = arith.constant 0 : index
      %c0_48 = arith.constant 0 : index
      %110 = vector.load %arg8[%c0_47, %c0_48] : memref<8x128xf32, #tpu.memory_space<vmem>>, vector<8x128xf32>
      tpu.vector_store %arg8[%c0_47, %c0_48], %109 {strides = array<i32>} : memref<8x128xf32, #tpu.memory_space<vmem>>, vector<8x128xf32>,
      %111 = vector.extract_strided_slice %92 {offsets = [0, 256], sizes = [8, 1], strides = [1, 1]} : vector<8x384xf32> to vector<8x1xf32>
      %c0_49 = arith.constant 0 : index
      %c0_50 = arith.constant 0 : index
      %112 = vector.load %arg9[%c0_49, %c0_50] : memref<8x1xf32, #tpu.memory_space<vmem>>, vector<8x1xf32>
      tpu.vector_store %arg9[%c0_49, %c0_50], %111 {strides = array<i32>} : memref<8x1xf32, #tpu.memory_space<vmem>>, vector<8x1xf32>,
      %cst_51 = arith.constant 0xFF800000 : f32
      %113 = vector.broadcast %cst_51 : f32 to vector<8x1xf32>
      %c0_52 = arith.constant 0 : index
      %c0_53 = arith.constant 0 : index
      %114 = vector.load %arg10[%c0_52, %c0_53] : memref<8x1xf32, #tpu.memory_space<vmem>>, vector<8x1xf32>
      tpu.vector_store %arg10[%c0_52, %c0_53], %113 {strides = array<i32>} : memref<8x1xf32, #tpu.memory_space<vmem>>, vector<8x1xf32>,
      %cst_54 = arith.constant 0.000000e+00 : f32
      %115 = vector.broadcast %cst_54 : f32 to vector<8x1xf32>
      %c0_55 = arith.constant 0 : index
      %c0_56 = arith.constant 0 : index
      %116 = vector.load %arg11[%c0_55, %c0_56] : memref<8x1xf32, #tpu.memory_space<vmem>>, vector<8x1xf32>
      tpu.vector_store %arg11[%c0_55, %c0_56], %115 {strides = array<i32>} : memref<8x1xf32, #tpu.memory_space<vmem>>, vector<8x1xf32>,
      %cst_57 = arith.constant 0.000000e+00 : f32
      %117 = vector.broadcast %cst_57 : f32 to vector<8x128xf32>
      %c0_58 = arith.constant 0 : index
      %c0_59 = arith.constant 0 : index
      %118 = vector.load %arg12[%c0_58, %c0_59] : memref<8x128xf32, #tpu.memory_space<vmem>>, vector<8x128xf32>
      tpu.vector_store %arg12[%c0_58, %c0_59], %117 {strides = array<i32>} : memref<8x128xf32, #tpu.memory_space<vmem>>, vector<8x128xf32>,
    } else {
    }
    %c0_2 = arith.constant 0 : index
    %c0_3 = arith.constant 0 : index
    %4 = vector.load %arg3[%c0_2, %c0_3] : memref<8x256xf32, #tpu.memory_space<vmem>>, vector<8x256xf32>
    %c0_4 = arith.constant 0 : index
    %c0_5 = arith.constant 0 : index
    %5 = vector.load %arg4[%c0_4, %c0_5] : memref<256x1280xbf16, #tpu.memory_space<vmem>>, vector<256x256xbf16>
    %6 = arith.extf %5 : vector<256x256xbf16> to vector<256x256xf32>
    %cst = arith.constant dense<0.000000e+00> : vector<8x256xf32>
    %7 = tpu.matmul %4, %6, %cst {dimension_numbers = #tpu.dot_dimension_numbers<[1], [0], [0], [1], [0, 0, 1, 1], [], []>} : vector<8x256xf32>, vector<256x256xf32>, vector<8x256xf32> -> vector<8x256xf32>
    %8 = vector.extract_strided_slice %0 {offsets = [0, 0], sizes = [1, 256], strides = [1, 1]} : vector<8x384xf32> to vector<1x256xf32>
    %9 = vector.broadcast %8 : vector<1x256xf32> to vector<8x256xf32>
    %10 = arith.addf %7, %9 : vector<8x256xf32>
    %11 = math.tanh %10 : vector<8x256xf32>
    %12 = vector.extract_strided_slice %11 {offsets = [0, 0], sizes = [8, 128], strides = [1, 1]} : vector<8x256xf32> to vector<8x128xf32>
    %13 = vector.extract_strided_slice %11 {offsets = [0, 128], sizes = [8, 128], strides = [1, 1]} : vector<8x256xf32> to vector<8x128xf32>
    %14 = vector.extract_strided_slice %4 {offsets = [0, 0], sizes = [8, 128], strides = [1, 1]} : vector<8x256xf32> to vector<8x128xf32>
    %15 = vector.extract_strided_slice %4 {offsets = [0, 128], sizes = [8, 128], strides = [1, 1]} : vector<8x256xf32> to vector<8x128xf32>
    %16 = arith.mulf %12, %15 : vector<8x128xf32>
    %cst_6 = arith.constant 1.000000e+00 : f32
    %17 = vector.broadcast %cst_6 : f32 to vector<8x128xf32>
    %18 = arith.subf %17, %12 : vector<8x128xf32>
    %19 = arith.mulf %18, %13 : vector<8x128xf32>
    %20 = arith.mulf %19, %14 : vector<8x128xf32>
    %21 = arith.addf %16, %20 : vector<8x128xf32>
    %c0_7 = arith.constant 0 : index
    %c256 = arith.constant 256 : index
    %22 = vector.load %arg4[%c0_7, %c256] : memref<256x1280xbf16, #tpu.memory_space<vmem>>, vector<128x128xbf16>
    %23 = arith.extf %22 : vector<128x128xbf16> to vector<128x128xf32>
    %cst_8 = arith.constant dense<0.000000e+00> : vector<8x128xf32>
    %24 = tpu.matmul %21, %23, %cst_8 {dimension_numbers = #tpu.dot_dimension_numbers<[1], [0], [0], [1], [0, 0, 1, 1], [], []>} : vector<8x128xf32>, vector<128x128xf32>, vector<8x128xf32> -> vector<8x128xf32>
    %25 = vector.extract_strided_slice %0 {offsets = [1, 0], sizes = [1, 128], strides = [1, 1]} : vector<8x384xf32> to vector<1x128xf32>
    %26 = vector.broadcast %25 : vector<1x128xf32> to vector<8x128xf32>
    %27 = arith.addf %24, %26 : vector<8x128xf32>
    %28 = arith.negf %27 : vector<8x128xf32>
    %29 = math.exp %28 : vector<8x128xf32>
    %cst_9 = arith.constant 1.000000e+00 : f32
    %30 = vector.broadcast %cst_9 : f32 to vector<8x128xf32>
    %31 = arith.addf %30, %29 : vector<8x128xf32>
    %32 = arith.divf %30, %31 : vector<8x128xf32>
    %33 = arith.mulf %27, %32 : vector<8x128xf32>
    %c0_10 = arith.constant 0 : index
    %c768 = arith.constant 768 : index
    %34 = vector.load %arg4[%c0_10, %c768] : memref<256x1280xbf16, #tpu.memory_space<vmem>>, vector<128x256xbf16>
    %35 = arith.extf %34 : vector<128x256xbf16> to vector<128x256xf32>
    %cst_11 = arith.constant dense<0.000000e+00> : vector<8x256xf32>
    %36 = tpu.matmul %33, %35, %cst_11 {dimension_numbers = #tpu.dot_dimension_numbers<[1], [0], [0], [1], [0, 0, 1, 1], [], []>} : vector<8x128xf32>, vector<128x256xf32>, vector<8x256xf32> -> vector<8x256xf32>
    %37 = vector.extract_strided_slice %0 {offsets = [2, 128], sizes = [1, 256], strides = [1, 1]} : vector<8x384xf32> to vector<1x256xf32>
    %38 = vector.broadcast %37 : vector<1x256xf32> to vector<8x256xf32>
    %39 = arith.addf %36, %38 : vector<8x256xf32>
    %40 = vector.extract_strided_slice %39 {offsets = [0, 0], sizes = [8, 128], strides = [1, 1]} : vector<8x256xf32> to vector<8x128xf32>
    %41 = vector.extract_strided_slice %39 {offsets = [0, 128], sizes = [8, 128], strides = [1, 1]} : vector<8x256xf32> to vector<8x128xf32>
    %c0_12 = arith.constant 0 : index
    %c0_13 = arith.constant 0 : index
    %42 = vector.load %arg7[%c0_12, %c0_13] : memref<8x128xf32, #tpu.memory_space<vmem>>, vector<8x128xf32>
    %cst_14 = arith.constant dense<0.000000e+00> : vector<8x8xf32>
    %43 = tpu.matmul %42, %40, %cst_14 {dimension_numbers = #tpu.dot_dimension_numbers<[1], [1], [0], [0], [0, 0, 1, 0], [], []>} : vector<8x128xf32>, vector<8x128xf32>, vector<8x8xf32> -> vector<8x8xf32>
    %c0_15 = arith.constant 0 : index
    %c0_16 = arith.constant 0 : index
    %44 = vector.load %arg10[%c0_15, %c0_16] : memref<8x1xf32, #tpu.memory_space<vmem>>, vector<8x1xf32>
    %cst_17 = arith.constant dense<0xFF800000> : vector<8xf32>
    %45 = vector.multi_reduction <maximumf>, %43, %cst_17 [1] : vector<8x8xf32> to vector<8xf32>
    %46 = vector.shape_cast %45 : vector<8xf32> to vector<8x1xf32>
    %47 = arith.maximumf %44, %46 : vector<8x1xf32>
    %48 = arith.subf %44, %47 : vector<8x1xf32>
    %49 = math.exp %48 : vector<8x1xf32>
    %50 = vector.broadcast %47 : vector<8x1xf32> to vector<8x8xf32>
    %51 = arith.subf %43, %50 : vector<8x8xf32>
    %52 = math.exp %51 : vector<8x8xf32>
    %c0_18 = arith.constant 0 : index
    %c0_19 = arith.constant 0 : index
    %53 = vector.load %arg11[%c0_18, %c0_19] : memref<8x1xf32, #tpu.memory_space<vmem>>, vector<8x1xf32>
    %54 = arith.mulf %49, %53 : vector<8x1xf32>
    %cst_20 = arith.constant dense<0.000000e+00> : vector<8xf32>
    %55 = vector.multi_reduction <add>, %52, %cst_20 [1] : vector<8x8xf32> to vector<8xf32>
    %56 = vector.shape_cast %55 : vector<8xf32> to vector<8x1xf32>
    %57 = arith.addf %54, %56 : vector<8x1xf32>
    %c0_21 = arith.constant 0 : index
    %c0_22 = arith.constant 0 : index
    %58 = vector.load %arg11[%c0_21, %c0_22] : memref<8x1xf32, #tpu.memory_space<vmem>>, vector<8x1xf32>
    tpu.vector_store %arg11[%c0_21, %c0_22], %57 {strides = array<i32>} : memref<8x1xf32, #tpu.memory_space<vmem>>, vector<8x1xf32>,
    %c0_23 = arith.constant 0 : index
    %c0_24 = arith.constant 0 : index
    %59 = vector.load %arg12[%c0_23, %c0_24] : memref<8x128xf32, #tpu.memory_space<vmem>>, vector<8x128xf32>
    %60 = vector.broadcast %49 : vector<8x1xf32> to vector<8x128xf32>
    %61 = arith.mulf %60, %59 : vector<8x128xf32>
    %cst_25 = arith.constant dense<0.000000e+00> : vector<8x128xf32>
    %62 = tpu.matmul %52, %41, %cst_25 {dimension_numbers = #tpu.dot_dimension_numbers<[1], [0], [0], [1], [0, 0, 1, 1], [], []>} : vector<8x8xf32>, vector<8x128xf32>, vector<8x128xf32> -> vector<8x128xf32>
    %63 = arith.addf %61, %62 : vector<8x128xf32>
    %c0_26 = arith.constant 0 : index
    %c0_27 = arith.constant 0 : index
    %64 = vector.load %arg12[%c0_26, %c0_27] : memref<8x128xf32, #tpu.memory_space<vmem>>, vector<8x128xf32>
    tpu.vector_store %arg12[%c0_26, %c0_27], %63 {strides = array<i32>} : memref<8x128xf32, #tpu.memory_space<vmem>>, vector<8x128xf32>,
    %c0_28 = arith.constant 0 : index
    %c0_29 = arith.constant 0 : index
    %65 = vector.load %arg10[%c0_28, %c0_29] : memref<8x1xf32, #tpu.memory_space<vmem>>, vector<8x1xf32>
    tpu.vector_store %arg10[%c0_28, %c0_29], %47 {strides = array<i32>} : memref<8x1xf32, #tpu.memory_space<vmem>>, vector<8x1xf32>,
    %c0_i32_30 = arith.constant 0 : i32
    %66 = arith.cmpi eq, %arg1, %c0_i32_30 : i32
    %67 = arith.extui %66 : i1 to i32
    %c0_i32_31 = arith.constant 0 : i32
    %68 = arith.cmpi ne, %67, %c0_i32_31 : i32
    scf.if %68 {
      %c0_32 = arith.constant 0 : index
      %c0_33 = arith.constant 0 : index
      %69 = vector.load %arg12[%c0_32, %c0_33] : memref<8x128xf32, #tpu.memory_space<vmem>>, vector<8x128xf32>
      %c0_34 = arith.constant 0 : index
      %c0_35 = arith.constant 0 : index
      %70 = vector.load %arg11[%c0_34, %c0_35] : memref<8x1xf32, #tpu.memory_space<vmem>>, vector<8x1xf32>
      %71 = tpu.reciprocal %70 : vector<8x1xf32> -> vector<8x1xf32>
      %72 = vector.broadcast %71 : vector<8x1xf32> to vector<8x128xf32>
      %73 = arith.mulf %69, %72 : vector<8x128xf32>
      %c0_36 = arith.constant 0 : index
      %c0_37 = arith.constant 0 : index
      %74 = vector.load %arg8[%c0_36, %c0_37] : memref<8x128xf32, #tpu.memory_space<vmem>>, vector<8x128xf32>
      %c0_38 = arith.constant 0 : index
      %c1024 = arith.constant 1024 : index
      %75 = vector.load %arg4[%c0_38, %c1024] : memref<256x1280xbf16, #tpu.memory_space<vmem>>, vector<128x128xbf16>
      %76 = arith.extf %75 : vector<128x128xbf16> to vector<128x128xf32>
      %cst_39 = arith.constant dense<0.000000e+00> : vector<8x128xf32>
      %77 = tpu.matmul %74, %76, %cst_39 {dimension_numbers = #tpu.dot_dimension_numbers<[1], [0], [0], [1], [0, 0, 1, 1], [], []>} : vector<8x128xf32>, vector<128x128xf32>, vector<8x128xf32> -> vector<8x128xf32>
      %78 = vector.extract_strided_slice %0 {offsets = [3, 0], sizes = [1, 128], strides = [1, 1]} : vector<8x384xf32> to vector<1x128xf32>
      %79 = vector.broadcast %78 : vector<1x128xf32> to vector<8x128xf32>
      %80 = arith.addf %77, %79 : vector<8x128xf32>
      %81 = arith.negf %80 : vector<8x128xf32>
      %82 = math.exp %81 : vector<8x128xf32>
      %cst_40 = arith.constant 1.000000e+00 : f32
      %83 = vector.broadcast %cst_40 : f32 to vector<8x128xf32>
      %84 = arith.addf %83, %82 : vector<8x128xf32>
      %85 = arith.divf %83, %84 : vector<8x128xf32>
      %86 = arith.mulf %85, %73 : vector<8x128xf32>
      %c0_41 = arith.constant 0 : index
      %c1152 = arith.constant 1152 : index
      %87 = vector.load %arg4[%c0_41, %c1152] : memref<256x1280xbf16, #tpu.memory_space<vmem>>, vector<128x128xbf16>
      %88 = arith.extf %87 : vector<128x128xbf16> to vector<128x128xf32>
      %cst_42 = arith.constant dense<0.000000e+00> : vector<8x128xf32>
      %89 = tpu.matmul %86, %88, %cst_42 {dimension_numbers = #tpu.dot_dimension_numbers<[1], [0], [0], [1], [0, 0, 1, 1], [], []>} : vector<8x128xf32>, vector<128x128xf32>, vector<8x128xf32> -> vector<8x128xf32>
      %90 = vector.extract_strided_slice %0 {offsets = [4, 0], sizes = [1, 128], strides = [1, 1]} : vector<8x384xf32> to vector<1x128xf32>
      %91 = vector.broadcast %90 : vector<1x128xf32> to vector<8x128xf32>
      %92 = arith.addf %89, %91 : vector<8x128xf32>
      %93 = arith.addf %74, %92 : vector<8x128xf32>
      %94 = math.tanh %93 : vector<8x128xf32>
      %c0_43 = arith.constant 0 : index
      %c0_44 = arith.constant 0 : index
      %95 = vector.load %arg9[%c0_43, %c0_44] : memref<8x1xf32, #tpu.memory_space<vmem>>, vector<8x1xf32>
      %96 = math.tanh %95 : vector<8x1xf32>
      %97 = vector.broadcast %96 : vector<8x1xf32> to vector<8x128xf32>
      %98 = arith.mulf %97, %94 : vector<8x128xf32>
      %cst_45 = arith.constant 1.000000e+00 : f32
      %99 = vector.broadcast %cst_45 : f32 to vector<8x1xf32>
      %100 = arith.subf %99, %96 : vector<8x1xf32>
      %101 = vector.broadcast %100 : vector<8x1xf32> to vector<8x128xf32>
      %102 = arith.mulf %101, %74 : vector<8x128xf32>
      %103 = arith.addf %98, %102 : vector<8x128xf32>
      %104 = vector.extract_strided_slice %0 {offsets = [5, 0], sizes = [1, 128], strides = [1, 1]} : vector<8x384xf32> to vector<1x128xf32>
      %105 = vector.broadcast %104 : vector<1x128xf32> to vector<8x128xf32>
      %106 = arith.mulf %103, %105 : vector<8x128xf32>
      %cst_46 = arith.constant dense<0.000000e+00> : vector<8xf32>
      %107 = vector.multi_reduction <add>, %106, %cst_46 [1] : vector<8x128xf32> to vector<8xf32>
      %108 = vector.shape_cast %107 : vector<8xf32> to vector<8x1xf32>
      %109 = arith.negf %108 : vector<8x1xf32>
      %110 = math.exp %109 : vector<8x1xf32>
      %cst_47 = arith.constant 1.000000e+00 : f32
      %111 = vector.broadcast %cst_47 : f32 to vector<8x1xf32>
      %112 = arith.addf %111, %110 : vector<8x1xf32>
      %113 = arith.divf %111, %112 : vector<8x1xf32>
      %114 = vector.shape_cast %113 : vector<8x1xf32> to vector<8x1xf32>
      %115 = vector.broadcast %114 : vector<8x1xf32> to vector<8x128xf32>
      %c0_48 = arith.constant 0 : index
      %c0_49 = arith.constant 0 : index
      %116 = vector.load %arg6[%c0_48, %c0_49] : memref<8x128xf32, #tpu.memory_space<vmem>>, vector<8x128xf32>
      tpu.vector_store %arg6[%c0_48, %c0_49], %115 {strides = array<i32>} : memref<8x128xf32, #tpu.memory_space<vmem>>, vector<8x128xf32>,
    } else {
    }
    return
  }
  func.func @transform_0(%arg0: i32, %arg1: i32) -> (i32, i32) {
    %c0_i32 = arith.constant 0 : i32
    %c0_i32_0 = arith.constant 0 : i32
    return %arg0, %c0_i32 : i32, i32
  }
  func.func @transform_1(%arg0: i32, %arg1: i32) -> (i32, i32) {
    %c0_i32 = arith.constant 0 : i32
    %c0_i32_0 = arith.constant 0 : i32
    return %arg1, %c0_i32 : i32, i32
  }
  func.func @transform_2(%arg0: i32, %arg1: i32) -> (i32, i32) {
    %c0_i32 = arith.constant 0 : i32
    %c0_i32_0 = arith.constant 0 : i32
    %c0_i32_1 = arith.constant 0 : i32
    return %c0_i32, %c0_i32_0 : i32, i32
  }
  func.func @transform_3(%arg0: i32, %arg1: i32) -> (i32, i32) {
    %c0_i32 = arith.constant 0 : i32
    %c0_i32_0 = arith.constant 0 : i32
    %c0_i32_1 = arith.constant 0 : i32
    return %c0_i32, %c0_i32_0 : i32, i32
  }
  func.func @transform_4(%arg0: i32, %arg1: i32) -> (i32, i32) {
    %c0_i32 = arith.constant 0 : i32
    %c0_i32_0 = arith.constant 0 : i32
    return %arg0, %c0_i32 : i32, i32
  }
}

</mosaic_0001>

<bundles_post_ra>
// kernel: forward.1
= control target key start
LH: loop header
LB: loop body
LE: loop exit
PB: predicated region body
PF: predicated region fallthrough
CT: control target
= control target key end

     0   :  { %9 = vsyncpa [#allocation9], 0  ;;  %s2379_s15 = smov [#allocation8]   ;;  %s2705_s0 = inlined_call_operand.vmem [shape: f32[8,256], index: 0, kind: input, shape index: {}, may-alias: {0,1}]   ;;  %s2706_s1 = inlined_call_operand.vmem [shape: f32[8,256], index: 1, kind: input, shape index: {}, may-alias: {0,1}]   ;;  %s2707_s2 = inlined_call_operand.hbm [shape: bf16[256,1280], index: 2, kind: input, shape index: {}]   ;;  %s2708_s3 = inlined_call_operand.vmem [shape: f32[8,384], index: 3, kind: input, shape index: {}]   ;;  %s2709_s4 = inlined_call_operand.vmem [shape: f32[8,128], index: 4, kind: output, shape index: {}]  }
   0x1   :  { %s19_s16 = sshll.u32 %s2379_s15, 4  ;;  %s2355_s19 = scalar_lea.hbm %s2707_s2, 20480  ;;  %s20_s16 = int_to_ptr.vmem [resolvable:$true] %s19_s16 }
   0x2   :  { %p2356_p0 = scmp.ne.s32.totalorder %s2707_s2, %s2355_s19  ;;  %p2359_p1 = scmp.lt.u32.totalorder %s2355_s19, %s2707_s2 }
   0x4   :  { %p2361_p2 = pnand %p2359_p1, %p2356_p0 }
   0x6   :  { %2364 = shalt.err (!%p2361_p2)
}
   0x7   :  { %s2365_s24 = scalar_lea.vmem %s20_s16, 20480  ;;  %p2370_p4 = scmp.lt.s32.totalorder %s20_s16, %s20_s16 }
   0x8   :  { %p2366_p3 = scmp.ne.s32.totalorder %s20_s16, %s2365_s24  ;;  %p2371_p5 = scmp.lt.s32.totalorder %s2365_s24, %s2365_s24 }
   0xa   :  { %p2372_p6 = por %p2371_p5, %p2370_p4 }
   0xc   :  { %p2373_p7 = pnand %p2372_p6, %p2366_p3 }
   0xe   :  { %2376 = shalt.err (!%p2373_p7)
}
   0xf   :  { %s2380_s25 = smov 640   ;;  %s2381_s26 = smov 40  }
  0x10   :  { %25 = dma.hbm_to_vmem [thread:$0]  %s2707_s2, 20480, %s20_s16, [#allocation9], %s2380_s25, %s2380_s25, %s2381_s26  }
  0x11   :  { %2377 = dma.done.wait [#allocation9], 20480  }
  0x12   :  { %2378 = vsyncadd [#allocation9], 4294946816  ;;  %v2424_v0 = vld [vmem:[#allocation8 + $0x4] ss:$40 sps:$4 sm:$0xff]   ;;  %v2426_v1 = vld [vmem:[#allocation8] ss:$40 sps:$4 sm:$0xff]   ;;  %v136_v52 = vlaneseq }
  0x13   :  { %1728 = vmatprep.subr.bf16.mxu0 %v2424_v0  ;;  %v2429_v2 = vld [vmem:[#allocation8 + $0x54] ss:$40 sps:$4 sm:$0xff]   ;;  %v2432_v3 = vld [vmem:[#allocation8 + $0x50] ss:$40 sps:$4 sm:$0xff]   ;;  %v2435_v4 = vld [vmem:[#allocation8 + $0xa4] ss:$40 sps:$4 sm:$0xff]  }
  0x14   :  { %1730 = vmatpush1.bf16.msra.mxu0 %v2426_v1  ;;  %v2438_v5 = vld [vmem:[#allocation8 + $0xa0] ss:$40 sps:$4 sm:$0xff]   ;;  %v2441_v6 = vld [vmem:[#allocation8 + $0xf4] ss:$40 sps:$4 sm:$0xff]   ;;  %v2444_v7 = vld [vmem:[#allocation8 + $0xf0] ss:$40 sps:$4 sm:$0xff]  }
  0x15   :  { %1732 = vmatprep.subr.bf16.mxu0 %v2429_v2  ;;  %v2447_v8 = vld [vmem:[#allocation8 + $0x144] ss:$40 sps:$4 sm:$0xff]   ;;  %v2450_v9 = vld [vmem:[#allocation8 + $0x140] ss:$40 sps:$4 sm:$0xff]   ;;  %v2453_v10 = vld [vmem:[#allocation8 + $0x194] ss:$40 sps:$4 sm:$0xff]  }
  0x16   :  { %v2456_v11 = vld [vmem:[#allocation8 + $0x190] ss:$40 sps:$4 sm:$0xff]   ;;  %v2459_v12 = vld [vmem:[#allocation8 + $0x1e4] ss:$40 sps:$4 sm:$0xff]   ;;  %v2461_v13 = vld [vmem:[#allocation8 + $0x1e0] ss:$40 sps:$4 sm:$0xff]  }
  0x17   :  { %v2466_v14 = vld [vmem:[%s2705_s0 + $0x8] sm:$0xff]  ;;  %v2236_v18 = vld [vmem:[#allocation8 + $0x5c] ss:$40 sps:$4 sm:$0xff]   ;;  %v2238_v20 = vld [vmem:[#allocation8 + $0x58] ss:$40 sps:$4 sm:$0xff]   ;;  %v2382_v47 = vmov 0.0  }
  0x18   :  { %1734 = vmatpush1.bf16.msra.mxu0 %v2432_v3  ;;  %208 = vmatprep.mubr.f32.mxu0 %v2466_v14  ;;  %v2233_v15 = vld [vmem:[#allocation8 + $0xc] ss:$40 sps:$4 sm:$0xff]   ;;  %v2235_v16 = vld [vmem:[#allocation8 + $0x8] ss:$40 sps:$4 sm:$0xff]   ;;  %v2242_v40 = vld [vmem:[#allocation8 + $0xfc] ss:$40 sps:$4 sm:$0xff]  }
  0x19   :  { %1736 = vmatprep.subr.bf16.mxu0 %v2435_v4  ;;  %v2471_v17 = vld [vmem:[#allocation8 + $0x234] ss:$40 sps:$4 sm:$0xff]   ;;  %1792 = vmatprep.subr.bf16.mxu1 %v2233_v15  ;;  %v2473_v19 = vld [vmem:[#allocation8 + $0x230] ss:$40 sps:$4 sm:$0xff]   ;;  %v2475_v21 = vld [vmem:[#allocation8 + $0x284] ss:$40 sps:$4 sm:$0xff]  }
  0x1a   :  { %1794 = vmatpush1.bf16.msra.mxu1 %v2235_v16  ;;  %v2239_v22 = vld [vmem:[#allocation8 + $0xac] ss:$40 sps:$4 sm:$0xff]   ;;  %v2241_v23 = vld [vmem:[#allocation8 + $0xa8] ss:$40 sps:$4 sm:$0xff]   ;;  %v2244_v41 = vld [vmem:[#allocation8 + $0xf8] ss:$40 sps:$4 sm:$0xff]   ;;  %378 = vmatprep.mubr.f32.mxu1 %v2382_v47 }
  0x1b   :  { %1796 = vmatprep.subr.bf16.mxu1 %v2236_v18  ;;  %v2479_v24 = vld [vmem:[#allocation8 + $0x280] ss:$40 sps:$4 sm:$0xff]   ;;  %v2481_v25 = vld [vmem:[#allocation8 + $0x2d4] ss:$40 sps:$4 sm:$0xff]   ;;  %v2485_v26 = vld [vmem:[#allocation8 + $0x2d0] ss:$40 sps:$4 sm:$0xff]  }
  0x1c   :  { %1738 = vmatpush1.bf16.msra.mxu0 %v2438_v5  ;;  %v2487_v27 = vld [vmem:[#allocation8 + $0x324] ss:$40 sps:$4 sm:$0xff]   ;;  %v2491_v28 = vld [vmem:[#allocation8 + $0x320] ss:$40 sps:$4 sm:$0xff]   ;;  %v2493_v29 = vld [vmem:[#allocation8 + $0x374] ss:$40 sps:$4 sm:$0xff]  }
  0x1d   :  { %1740 = vmatprep.subr.bf16.mxu0 %v2441_v6  ;;  %v2497_v30 = vld [vmem:[#allocation8 + $0x370] ss:$40 sps:$4 sm:$0xff]   ;;  %v2499_v31 = vld [vmem:[#allocation8 + $0x3c4] ss:$40 sps:$4 sm:$0xff]   ;;  %v2503_v32 = vld [vmem:[#allocation8 + $0x3c0] ss:$40 sps:$4 sm:$0xff]  }
  0x1e   :  { %1798 = vmatpush1.bf16.msra.mxu1 %v2238_v20  ;;  %v2505_v33 = vld [vmem:[#allocation8 + $0x414] ss:$40 sps:$4 sm:$0xff]   ;;  %v2509_v34 = vld [vmem:[#allocation8 + $0x410] ss:$40 sps:$4 sm:$0xff]   ;;  %v2511_v35 = vld [vmem:[#allocation8 + $0x464] ss:$40 sps:$4 sm:$0xff]  }
  0x1f   :  { %1800 = vmatprep.subr.bf16.mxu1 %v2239_v22  ;;  %v2515_v36 = vld [vmem:[#allocation8 + $0x460] ss:$40 sps:$4 sm:$0xff]   ;;  %v2517_v37 = vld [vmem:[#allocation8 + $0x4b4] ss:$40 sps:$4 sm:$0xff]   ;;  %v2521_v38 = vld [vmem:[#allocation8 + $0x4b0] ss:$40 sps:$4 sm:$0xff]  }
  0x20   :  { %1742 = vmatpush1.bf16.msra.mxu0 %v2444_v7  ;;  %v38_v39 = vld [vmem:[%s2705_s0] sm:$0xff]  ;;  %v2248_v44 = vld [vmem:[#allocation8 + $0x19c] ss:$40 sps:$4 sm:$0xff]   ;;  %v2250_v45 = vld [vmem:[#allocation8 + $0x198] ss:$40 sps:$4 sm:$0xff]   ;;  %v2383_v48 = vmov 0.0|0.0  }
  0x21   :  { %1744 = vmatprep.subr.bf16.mxu0 %v2447_v8  ;;  %v2245_v42 = vld [vmem:[#allocation8 + $0x14c] ss:$40 sps:$4 sm:$0xff]   ;;  %v2247_v43 = vld [vmem:[#allocation8 + $0x148] ss:$40 sps:$4 sm:$0xff]   ;;  %v2254_v50 = vld [vmem:[#allocation8 + $0x23c] ss:$40 sps:$4 sm:$0xff]  }
  0x22   :  { %1802 = vmatpush1.bf16.msra.mxu1 %v2241_v23  ;;  %v2251_v46 = vld [vmem:[#allocation8 + $0x1ec] ss:$40 sps:$4 sm:$0xff]   ;;  %v2253_v49 = vld [vmem:[#allocation8 + $0x1e8] ss:$40 sps:$4 sm:$0xff]   ;;  %v2256_v51 = vld [vmem:[#allocation8 + $0x238] ss:$40 sps:$4 sm:$0xff]  }
  0x23   :  { %1804 = vmatprep.subr.bf16.mxu1 %v2242_v40  ;;  %vm2384_vm0 = vmmov 0   ;;  %v2534_v53 = vshrl.u32 %v136_v52, 7  ;;  %v2540_v55 = vld [vmem:[%s2708_s3] sm:$0xff]  ;;  %v2545_v56 = vld [vmem:[%s2708_s3 + $0x8] sm:$0xff]  ;;  %vm571_vm1 = vcmask 7168   ;;  %vm1072_vm2 = vcmask 64512  }
  0x24   :  { %1746 = vmatpush1.bf16.msra.mxu0 %v2450_v9  ;;  %v2257_v23 = vld [vmem:[#allocation8 + $0x10] ss:$40 sps:$4 sm:$0xff]   ;;  %574 = vst.msk [vmem:[#allocation6] sm:$0xff] %vm571_vm1, %v2382_v47 }
  0x25   :  { %1748 = vmatprep.subr.bf16.mxu0 %v2453_v10  ;;  %v138_v54 = vsub.s32 0, %v2534_v53 }
  0x26   :  { %1806 = vmatpush1.bf16.msra.mxu1 %v2244_v41  ;;  %v2258_v41 = vld [vmem:[#allocation8 + $0x60] ss:$40 sps:$4 sm:$0xff]  }
  0x27   :  { %1808 = vmatprep.subr.bf16.mxu1 %v2245_v42  ;;  %v2548_v57 = vrot.slane %v2540_v55, %v138_v54  ;;  %v2551_v58 = vrot.slane %v2545_v56, %v138_v54  ;;  %v2259_v42 = vld [vmem:[#allocation8 + $0xb0] ss:$40 sps:$4 sm:$0xff]  }
  0x28   :  { %1750 = vmatpush1.bf16.msra.mxu0 %v2456_v11 }
  0x29   :  { %1752 = vmatprep.subr.bf16.mxu0 %v2459_v12 }
  0x2a   :  { %1810 = vmatpush1.bf16.msra.mxu1 %v2247_v43  ;;  %v2260_v43 = vld [vmem:[#allocation8 + $0x100] ss:$40 sps:$4 sm:$0xff]  }
  0x2b   :  { %1812 = vmatprep.subr.bf16.mxu1 %v2248_v44  ;;  %v2263_v44 = vld [vmem:[#allocation8 + $0x1f0] ss:$40 sps:$4 sm:$0xff]  }
  0x2c   :  { %1754 = vmatpush1.bf16.msra.mxu0 %v2461_v13 }
  0x2d   :  { %1756 = vmatprep.subr.bf16.mxu0 %v2471_v17 }
  0x2e   :  { %1814 = vmatpush1.bf16.msra.mxu1 %v2250_v45  ;;  %v2264_v45 = vld [vmem:[#allocation8 + $0x240] ss:$40 sps:$4 sm:$0xff]  }
  0x2f   :  { %1816 = vmatprep.subr.bf16.mxu1 %v2251_v46  ;;  %v2569_v46 = vld [vmem:[%s2706_s1 + $0x8] sm:$0xff] }
  0x30   :  { %1758 = vmatpush1.bf16.msra.mxu0 %v2473_v19 }
  0x31   :  { %1760 = vmatprep.subr.bf16.mxu0 %v2475_v21 }
  0x32   :  { %1818 = vmatpush1.bf16.msra.mxu1 %v2253_v49 }
  0x33   :  { %1820 = vmatprep.subr.bf16.mxu1 %v2254_v50 }
  0x34   :  { %1762 = vmatpush1.bf16.msra.mxu0 %v2479_v24 }
  0x35   :  { %1764 = vmatprep.subr.bf16.mxu0 %v2481_v25 }
  0x36   :  { %1822 = vmatpush1.bf16.msra.mxu1 %v2256_v51 }
  0x37   :  { %1823 = vmatprep.subr.bf16.mxu1 %v2383_v48 }
  0x38   :  { %1766 = vmatpush1.bf16.msra.mxu0 %v2485_v26 }
  0x39   :  { %1768 = vmatprep.subr.bf16.mxu0 %v2487_v27 }
  0x3c   :  { %1770 = vmatpush1.bf16.msra.mxu0 %v2491_v28 }
  0x3d   :  { %1772 = vmatprep.subr.bf16.mxu0 %v2493_v29 }
  0x40   :  { %1774 = vmatpush1.bf16.msra.mxu0 %v2497_v30 }
  0x41   :  { %1776 = vmatprep.subr.bf16.mxu0 %v2499_v31 }
  0x44   :  { %1778 = vmatpush1.bf16.msra.mxu0 %v2503_v32 }
  0x45   :  { %1780 = vmatprep.subr.bf16.mxu0 %v2505_v33 }
  0x48   :  { %1782 = vmatpush1.bf16.msra.mxu0 %v2509_v34 }
  0x49   :  { %1784 = vmatprep.subr.bf16.mxu0 %v2511_v35 }
  0x4c   :  { %1786 = vmatpush1.bf16.msra.mxu0 %v2515_v36 }
  0x4d   :  { %1788 = vmatprep.subr.bf16.mxu0 %v2517_v37 }
  0x50   :  { %1790 = vmatpush1.bf16.msra.mxu0 %v2521_v38 }
  0x51   :  { %1847 = vmatprep.subr.bf16.mxu0 %v2383_v48 }
  0x53   :  { %209 = vmatmul.mubr.f32.vlgmr.msra.gmra.mrb[0].mxu0 %v38_v39 }
  0x54   :  { %1609 = vmatprep.mubr.msk.f32.mxu0 %vm2384_vm0, %v2382_v47 }
 0x126   :  { %v210_v59 = vpop.f32.mrb[0].mxu0 }
 0x127   :  { %v211_v60 = vadd.f32 %v210_v59, %v2548_v57  ;;  %v212_v61 = vpop.f32.mrb[1].mxu0 }
 0x128   :  { %v213_v62 = vadd.f32 %v212_v61, %v2551_v58 }
 0x129   :  { %2321 = vtanh.f32 %v211_v60 }
 0x12a   :  { %2323 = vtanh.f32 %v213_v62 }
 0x133   :  { %v2322_v63 = vpop.eup %2321 }
 0x134   :  { %v2324_v15 = vpop.eup %2323  ;;  %v218_v16 = vsub.f32 1.0, %v2322_v63  ;;  %v217_v20 = vmul.f32 %v2322_v63, %v2466_v14  ;;  %v2261_v14 = vld [vmem:[#allocation8 + $0x150] ss:$40 sps:$4 sm:$0xff]  }
 0x136   :  { %v219_v18 = vmul.f32 %v2324_v15, %v218_v16  ;;  %v2281_v16 = vld [vmem:[#allocation8 + $0x1c] ss:$40 sps:$4 sm:$0xff]  }
 0x138   :  { %v220_v22 = vmul.f32 %v219_v18, %v38_v39  ;;  %v2262_v39 = vld [vmem:[#allocation8 + $0x1a0] ss:$40 sps:$4 sm:$0xff]  }
 0x139   :  { %v2283_v18 = vld [vmem:[#allocation8 + $0x18] ss:$40 sps:$4 sm:$0xff]  }
 0x13a   :  { %v221_v40 = vadd.f32 %v220_v22, %v217_v20  ;;  %v2287_v20 = vld [vmem:[#allocation8 + $0xbc] ss:$40 sps:$4 sm:$0xff]   ;;  %v2289_v22 = vld [vmem:[#allocation8 + $0xb8] ss:$40 sps:$4 sm:$0xff]  }
 0x13c   :  { %379 = vmatmul.mubr.f32.vlgmr.msra.gmra.mrb[0].mxu1 %v221_v40 }
 0x13d   :  { %1825 = vmatpush3.bf16.msra.mxu1 %v2257_v23  ;;  %1574 = vmatprep.mubr.msk.f32.mxu1 %vm2384_vm0, %v2382_v47  ;;  %v2290_v23 = vld [vmem:[#allocation8 + $0x10c] ss:$40 sps:$4 sm:$0xff]  }
 0x13e   :  { %1826 = vmatprep.subr.bf16.mxu1 %v2383_v48 }
 0x141   :  { %1828 = vmatpush3.bf16.msra.mxu1 %v2258_v41  ;;  %v2293_v41 = vld [vmem:[#allocation8 + $0x15c] ss:$40 sps:$4 sm:$0xff]  }
 0x142   :  { %1829 = vmatprep.subr.bf16.mxu1 %v2383_v48 }
 0x145   :  { %1831 = vmatpush3.bf16.msra.mxu1 %v2259_v42  ;;  %v2295_v42 = vld [vmem:[#allocation8 + $0x158] ss:$40 sps:$4 sm:$0xff]  }
 0x146   :  { %1832 = vmatprep.subr.bf16.mxu1 %v2383_v48 }
 0x149   :  { %1834 = vmatpush3.bf16.msra.mxu1 %v2260_v43  ;;  %v2296_v43 = vld [vmem:[#allocation8 + $0x1ac] ss:$40 sps:$4 sm:$0xff]  }
 0x14a   :  { %1835 = vmatprep.subr.bf16.mxu1 %v2383_v48 }
 0x14d   :  { %1837 = vmatpush3.bf16.msra.mxu1 %v2261_v14  ;;  %v2298_v14 = vld [vmem:[#allocation8 + $0x1a8] ss:$40 sps:$4 sm:$0xff]  }
 0x14e   :  { %1838 = vmatprep.subr.bf16.mxu1 %v2383_v48 }
 0x151   :  { %1840 = vmatpush3.bf16.msra.mxu1 %v2262_v39  ;;  %v2299_v39 = vld [vmem:[#allocation8 + $0x1fc] ss:$40 sps:$4 sm:$0xff]  }
 0x152   :  { %1841 = vmatprep.subr.bf16.mxu1 %v2383_v48 }
 0x155   :  { %1843 = vmatpush3.bf16.msra.mxu1 %v2263_v44  ;;  %v2301_v44 = vld [vmem:[#allocation8 + $0x1f8] ss:$40 sps:$4 sm:$0xff]  }
 0x156   :  { %1844 = vmatprep.subr.bf16.mxu1 %v2383_v48 }
 0x159   :  { %1846 = vmatpush3.bf16.msra.mxu1 %v2264_v45  ;;  %v2302_v45 = vld [vmem:[#allocation8 + $0x24c] ss:$40 sps:$4 sm:$0xff]  }
 0x15a   :  { %1872 = vmatprep.subr.bf16.mxu1 %v2424_v0  ;;  %v2265_v0 = vld [vmem:[#allocation8 + $0x14] ss:$40 sps:$4 sm:$0xff]  }
 0x15b   :  { %1849 = vmatpush3.bf16.msra.mxu0 %v2265_v0 }
 0x15c   :  { %1575 = vmatmul.mubr.f32.vlgmr.msra.gmra.mrb[2].mxu1 %v221_v40  ;;  %1850 = vmatprep.subr.bf16.mxu0 %v2383_v48  ;;  %v2292_v40 = vld [vmem:[#allocation8 + $0x108] ss:$40 sps:$4 sm:$0xff]  }
 0x15d   :  { %1874 = vmatpush1.bf16.msra.mxu1 %v2426_v1  ;;  %746 = vmatprep.mubr.f32.mxu1 %v2569_v46  ;;  %v2266_v1 = vld [vmem:[#allocation8 + $0x64] ss:$40 sps:$4 sm:$0xff]  }
 0x15e   :  { %1876 = vmatprep.subr.bf16.mxu1 %v2429_v2  ;;  %v2267_v2 = vld [vmem:[#allocation8 + $0xb4] ss:$40 sps:$4 sm:$0xff]  }
 0x15f   :  { %1852 = vmatpush3.bf16.msra.mxu0 %v2266_v1 }
 0x160   :  { %1853 = vmatprep.subr.bf16.mxu0 %v2383_v48 }
 0x161   :  { %1878 = vmatpush1.bf16.msra.mxu1 %v2432_v3  ;;  %v2608_v3 = vld [vmem:[%s2706_s1] sm:$0xff] }
 0x162   :  { %1880 = vmatprep.subr.bf16.mxu1 %v2435_v4  ;;  %v2268_v4 = vld [vmem:[#allocation8 + $0x104] ss:$40 sps:$4 sm:$0xff]  }
 0x163   :  { %1855 = vmatpush3.bf16.msra.mxu0 %v2267_v2 }
 0x164   :  { %1856 = vmatprep.subr.bf16.mxu0 %v2383_v48 }
 0x165   :  { %1882 = vmatpush1.bf16.msra.mxu1 %v2438_v5  ;;  %v2269_v5 = vld [vmem:[#allocation8 + $0x154] ss:$40 sps:$4 sm:$0xff]  }
 0x166   :  { %1884 = vmatprep.subr.bf16.mxu1 %v2441_v6  ;;  %v2270_v6 = vld [vmem:[#allocation8 + $0x1a4] ss:$40 sps:$4 sm:$0xff]  }
 0x167   :  { %1858 = vmatpush3.bf16.msra.mxu0 %v2268_v4 }
 0x168   :  { %1859 = vmatprep.subr.bf16.mxu0 %v2383_v48 }
 0x169   :  { %1886 = vmatpush1.bf16.msra.mxu1 %v2444_v7  ;;  %v2271_v7 = vld [vmem:[#allocation8 + $0x1f4] ss:$40 sps:$4 sm:$0xff]  }
 0x16a   :  { %1888 = vmatprep.subr.bf16.mxu1 %v2447_v8  ;;  %v2272_v8 = vld [vmem:[#allocation8 + $0x244] ss:$40 sps:$4 sm:$0xff]  }
 0x16b   :  { %1861 = vmatpush3.bf16.msra.mxu0 %v2269_v5 }
 0x16c   :  { %1862 = vmatprep.subr.bf16.mxu0 %v2383_v48 }
 0x16d   :  { %1890 = vmatpush1.bf16.msra.mxu1 %v2450_v9  ;;  %v2623_v9 = vsub.s32 1, %v2534_v53 }
 0x16e   :  { %1892 = vmatprep.subr.bf16.mxu1 %v2453_v10 }
 0x16f   :  { %1864 = vmatpush3.bf16.msra.mxu0 %v2270_v6  ;;  %v2627_v10 = vrot.slane %v2540_v55, %v2623_v9 }
 0x170   :  { %1865 = vmatprep.subr.bf16.mxu0 %v2383_v48 }
 0x171   :  { %1894 = vmatpush1.bf16.msra.mxu1 %v2456_v11 }
 0x172   :  { %1896 = vmatprep.subr.bf16.mxu1 %v2459_v12 }
 0x173   :  { %1867 = vmatpush3.bf16.msra.mxu0 %v2271_v7 }
 0x174   :  { %1868 = vmatprep.subr.bf16.mxu0 %v2383_v48 }
 0x175   :  { %1898 = vmatpush1.bf16.msra.mxu1 %v2461_v13 }
 0x176   :  { %1900 = vmatprep.subr.bf16.mxu1 %v2471_v17 }
 0x177   :  { %1870 = vmatpush3.bf16.msra.mxu0 %v2272_v8 }
 0x178   :  { %1935 = vmatprep.subr.bf16.mxu0 %v2383_v48 }
 0x179   :  { %1902 = vmatpush1.bf16.msra.mxu1 %v2473_v19 }
 0x17a   :  { %1904 = vmatprep.subr.bf16.mxu1 %v2475_v21 }
 0x17d   :  { %1906 = vmatpush1.bf16.msra.mxu1 %v2479_v24  ;;  %v2635_v24 = vld [vmem:[%s2708_s3 + $0x10] sm:$0xff] }
 0x17e   :  { %1908 = vmatprep.subr.bf16.mxu1 %v2481_v25 }
 0x181   :  { %1910 = vmatpush1.bf16.msra.mxu1 %v2485_v26  ;;  %v2273_v26 = vld [vmem:[#allocation8 + $0x8] ss:$40 sps:$4 sm:$0xff]  }
 0x182   :  { %1912 = vmatprep.subr.bf16.mxu1 %v2487_v27 }
 0x185   :  { %1914 = vmatpush1.bf16.msra.mxu1 %v2491_v28  ;;  %v313_v28 = vrot.slane %v2635_v24, %v2623_v9 }
 0x186   :  { %1916 = vmatprep.subr.bf16.mxu1 %v2493_v29 }
 0x189   :  { %1918 = vmatpush1.bf16.msra.mxu1 %v2497_v30  ;;  %v2274_v30 = vld [vmem:[#allocation8 + $0x58] ss:$40 sps:$4 sm:$0xff]  }
 0x18a   :  { %1920 = vmatprep.subr.bf16.mxu1 %v2499_v31 }
 0x18d   :  { %1922 = vmatpush1.bf16.msra.mxu1 %v2503_v32 }
 0x18e   :  { %1924 = vmatprep.subr.bf16.mxu1 %v2505_v33  ;;  %v2275_v33 = vld [vmem:[#allocation8 + $0xa8] ss:$40 sps:$4 sm:$0xff]  }
 0x191   :  { %1926 = vmatpush1.bf16.msra.mxu1 %v2509_v34  ;;  %v2276_v34 = vld [vmem:[#allocation8 + $0xf8] ss:$40 sps:$4 sm:$0xff]  }
 0x192   :  { %1928 = vmatprep.subr.bf16.mxu1 %v2511_v35  ;;  %v2277_v35 = vld [vmem:[#allocation8 + $0x148] ss:$40 sps:$4 sm:$0xff]  }
 0x195   :  { %1930 = vmatpush1.bf16.msra.mxu1 %v2515_v36  ;;  %v2278_v36 = vld [vmem:[#allocation8 + $0x198] ss:$40 sps:$4 sm:$0xff]  }
 0x196   :  { %1932 = vmatprep.subr.bf16.mxu1 %v2517_v37  ;;  %v2279_v37 = vld [vmem:[#allocation8 + $0x1e8] ss:$40 sps:$4 sm:$0xff]  }
 0x199   :  { %1934 = vmatpush1.bf16.msra.mxu1 %v2521_v38  ;;  %v2280_v38 = vld [vmem:[#allocation8 + $0x238] ss:$40 sps:$4 sm:$0xff]  }
 0x19a   :  { %1647 = vmatprep.subr.mxu1 %v2382_v47 }
 0x19c   :  { %747 = vmatmul.mubr.f32.vlgmr.msra.gmra.mrb[4].mxu1 %v2608_v3 }
 0x19d   :  { %1649 = vmatprep.mubr.msk.f32.mxu1 %vm2384_vm0, %v2382_v47 }
 0x20f   :  { %v380_v11 = vpop.f32.mrb[0].mxu1 }
 0x210   :  { %v381_v12 = vadd.f32 %v380_v11, %v2627_v10  ;;  %v2630_v13 = vpop.f32.mrb[1].mxu1 }
 0x212   :  { %v1448_v17 = vmul.f32 -1.442695, %v381_v12 }
 0x214   :  { %2325 = vpow2.f32 %v1448_v17 }
 0x21e   :  { %v2326_v19 = vpop.eup %2325 }
 0x21f   :  { %v458_v21 = vadd.f32 1.0, %v2326_v19 }
 0x221   :  { %2327 = vrcp.f32 %v458_v21 }
 0x22b   :  { %v2328_v25 = vpop.eup %2327 }
 0x22c   :  { %v461_v27 = vmul.f32 %v2328_v25, %v381_v12  ;;  %v496_v12 = vsub.s32 2, %v2534_v53 }
 0x22e   :  { %1610 = vmatmul.mubr.f32.vlgmr.msra.gmra.mrb[2].mxu0 %v461_v27  ;;  %v497_v17 = vrot.slane %v2540_v55, %v496_v12  ;;  %v924_v19 = vrot.slane %v2545_v56, %v496_v12 }
 0x22f   :  { %v451_v29 = vpop.f32.mrb[2].mxu1  ;;  %1937 = vmatpush3.bf16.msra.mxu0 %v2273_v26  ;;  %1644 = vmatprep.mubr.msk.f32.mxu0 %vm2384_vm0, %v2382_v47  ;;  %v928_v26 = vrot.slane %v2635_v24, %v496_v12 }
 0x230   :  { %v452_v31 = vadd.f32 %v451_v29, %v313_v28  ;;  %v1576_v32 = vpop.f32.mrb[3].mxu1  ;;  %1938 = vmatprep.subr.bf16.mxu0 %v2383_v48 }
 0x232   :  { %572 = vst.msk [vmem:[#allocation4] sm:$0xff] %vm571_vm1, %v452_v31 }
 0x233   :  { %1940 = vmatpush3.bf16.msra.mxu0 %v2274_v30  ;;  %v2385_v30 = vmov -inf  }
 0x234   :  { %1941 = vmatprep.subr.bf16.mxu0 %v2383_v48  ;;  %573 = vst.msk [vmem:[#allocation5] sm:$0xff] %vm571_vm1, %v2385_v30 }
 0x237   :  { %1943 = vmatpush3.bf16.msra.mxu0 %v2275_v33  ;;  %v2386_v33 = vmov 0  }
 0x238   :  { %1944 = vmatprep.subr.bf16.mxu0 %v2383_v48  ;;  %2183 = vset.pattern.permute.xlu0 %v2386_v33 }
 0x239   :  { %2184 = vset.pattern.permute.xlu1 %v2386_v33 }
 0x23b   :  { %1946 = vmatpush3.bf16.msra.mxu0 %v2276_v34  ;;  %v1071_v34 = vld [vmem:[#allocation5] sm:$0xff] }
 0x23c   :  { %1947 = vmatprep.subr.bf16.mxu0 %v2383_v48 }
 0x23f   :  { %1949 = vmatpush3.bf16.msra.mxu0 %v2277_v35 }
 0x240   :  { %1950 = vmatprep.subr.bf16.mxu0 %v2383_v48 }
 0x243   :  { %1952 = vmatpush3.bf16.msra.mxu0 %v2278_v36 }
 0x244   :  { %1953 = vmatprep.subr.bf16.mxu0 %v2383_v48 }
 0x247   :  { %1955 = vmatpush3.bf16.msra.mxu0 %v2279_v37 }
 0x248   :  { %1956 = vmatprep.subr.bf16.mxu0 %v2383_v48 }
 0x24b   :  { %1958 = vmatpush3.bf16.msra.mxu0 %v2280_v38 }
 0x24c   :  { %1960 = vmatprep.subr.bf16.mxu0 %v2281_v16  ;;  %v2310_v16 = vld [vmem:[#allocation8 + $0x1b0] ss:$40 sps:$4 sm:$0xff]  }
 0x26f   :  { %v748_v49 = vpop.f32.mrb[4].mxu1 }
 0x270   :  { %v749_v50 = vadd.f32 %v748_v49, %v2548_v57  ;;  %v750_v51 = vpop.f32.mrb[5].mxu1  ;;  %v2284_v57 = vld [vmem:[#allocation8 + $0x6c] ss:$40 sps:$4 sm:$0xff]  }
 0x271   :  { %v751_v52 = vadd.f32 %v750_v51, %v2551_v58  ;;  %v2286_v58 = vld [vmem:[#allocation8 + $0x68] ss:$40 sps:$4 sm:$0xff]  }
 0x272   :  { %2329 = vtanh.f32 %v749_v50  ;;  %v2305_v51 = vld [vmem:[#allocation8 + $0x20] ss:$40 sps:$4 sm:$0xff]  }
 0x273   :  { %2331 = vtanh.f32 %v751_v52 }
 0x27c   :  { %v2330_v54 = vpop.eup %2329 }
 0x27d   :  { %v2332_v59 = vpop.eup %2331  ;;  %v756_v60 = vsub.f32 1.0, %v2330_v54  ;;  %v755_v62 = vmul.f32 %v2330_v54, %v2569_v46  ;;  %v2304_v46 = vld [vmem:[#allocation8 + $0x248] ss:$40 sps:$4 sm:$0xff]  }
 0x27f   :  { %v757_v61 = vmul.f32 %v2332_v59, %v756_v60  ;;  %v2306_v59 = vld [vmem:[#allocation8 + $0x70] ss:$40 sps:$4 sm:$0xff]  }
 0x281   :  { %v758_v63 = vmul.f32 %v757_v61, %v2608_v3  ;;  %v2307_v61 = vld [vmem:[#allocation8 + $0xc0] ss:$40 sps:$4 sm:$0xff]  }
 0x283   :  { %v759_v15 = vadd.f32 %v758_v63, %v755_v62  ;;  %v2308_v62 = vld [vmem:[#allocation8 + $0x110] ss:$40 sps:$4 sm:$0xff]   ;;  %v2309_v63 = vld [vmem:[#allocation8 + $0x160] ss:$40 sps:$4 sm:$0xff]  }
 0x285   :  { %1645 = vmatmul.mubr.f32.vlgmr.msra.gmra.mrb[4].mxu0 %v759_v15 }
 0x286   :  { %993 = vmatprep.mubr.f32.mxu0 %v2382_v47  ;;  %1962 = vmatpush1.bf16.msra.mxu0 %v2283_v18  ;;  %v2312_v18 = vld [vmem:[#allocation8 + $0x250] ss:$40 sps:$4 sm:$0xff]  }
 0x287   :  { %1964 = vmatprep.subr.bf16.mxu0 %v2284_v57  ;;  %v309_v57 = vrot.slane %v2545_v56, %v2623_v9 }
 0x28a   :  { %1966 = vmatpush1.bf16.msra.mxu0 %v2286_v58  ;;  %v2683_v58 = vadd.f32 %v2630_v13, %v309_v57  ;;  %v2317_v13 = vld [vmem:[#allocation8 + $0x164] ss:$40 sps:$4 sm:$0xff]  }
 0x28b   :  { %1968 = vmatprep.subr.bf16.mxu0 %v2287_v20  ;;  %v2313_v20 = vld [vmem:[#allocation8 + $0x24] ss:$40 sps:$4 sm:$0xff]  }
 0x28e   :  { %1970 = vmatpush1.bf16.msra.mxu0 %v2289_v22  ;;  %v2314_v22 = vld [vmem:[#allocation8 + $0x74] ss:$40 sps:$4 sm:$0xff]  }
 0x28f   :  { %1972 = vmatprep.subr.bf16.mxu0 %v2290_v23  ;;  %v1088_v23 = vld [vmem:[#allocation6] sm:$0xff] }
 0x292   :  { %1974 = vmatpush1.bf16.msra.mxu0 %v2292_v40  ;;  %v2315_v40 = vld [vmem:[#allocation8 + $0xc4] ss:$40 sps:$4 sm:$0xff]  }
 0x293   :  { %1976 = vmatprep.subr.bf16.mxu0 %v2293_v41 }
 0x296   :  { %1978 = vmatpush1.bf16.msra.mxu0 %v2295_v42  ;;  %v2316_v42 = vld [vmem:[#allocation8 + $0x114] ss:$40 sps:$4 sm:$0xff]  }
 0x297   :  { %1980 = vmatprep.subr.bf16.mxu0 %v2296_v43  ;;  %v2318_v43 = vld [vmem:[#allocation8 + $0x1b4] ss:$40 sps:$4 sm:$0xff]  }
 0x29a   :  { %1982 = vmatpush1.bf16.msra.mxu0 %v2298_v14 }
 0x29b   :  { %1984 = vmatprep.subr.bf16.mxu0 %v2299_v39  ;;  %v1413_v39 = vld [vmem:[#allocation4] sm:$0xff] }
 0x29e   :  { %1986 = vmatpush1.bf16.msra.mxu0 %v2301_v44  ;;  %v2319_v44 = vld [vmem:[#allocation8 + $0x204] ss:$40 sps:$4 sm:$0xff]  }
 0x29f   :  { %1988 = vmatprep.subr.bf16.mxu0 %v2302_v45 }
 0x2a2   :  { %1990 = vmatpush1.bf16.msra.mxu0 %v2304_v46  ;;  %v2320_v46 = vld [vmem:[#allocation8 + $0x254] ss:$40 sps:$4 sm:$0xff]  }
 0x2a3   :  { %2015 = vmatprep.subr.bf16.mxu0 %v2383_v48 }
 0x301   :  { %v564_v0 = vpop.f32.mrb[2].mxu0 }
 0x302   :  { %v1611_v1 = vpop.f32.mrb[3].mxu0  ;;  %v565_v21 = vadd.f32 %v564_v0, %v497_v17 }
 0x304   :  { %v568_v28 = vmul.f32 0.17677669, %v565_v21 }
 0x358   :  { %v862_v2 = vpop.f32.mrb[4].mxu0 }
 0x359   :  { %v863_v3 = vadd.f32 %v862_v2, %v2627_v10  ;;  %v1646_v4 = vpop.f32.mrb[5].mxu0 }
 0x35b   :  { %v1449_v5 = vmul.f32 -1.442695, %v863_v3 }
 0x35d   :  { %2333 = vpow2.f32 %v1449_v5 }
 0x367   :  { %v2334_v6 = vpop.eup %2333 }
 0x368   :  { %v869_v7 = vadd.f32 1.0, %v2334_v6  ;;  %v1226_v6 = vsub.s32 3, %v2534_v53 }
 0x36a   :  { %2335 = vrcp.f32 %v869_v7  ;;  %v1227_v7 = vrot.slane %v2540_v55, %v1226_v6 }
 0x374   :  { %v2336_v8 = vpop.eup %2335 }
 0x375   :  { %v872_v11 = vmul.f32 %v2336_v8, %v863_v3 }
 0x377   :  { %994 = vmatmul.mubr.f32.vlgmr.msra.gmra.mrb[6].mxu0 %v872_v11 }
 0x378   :  { %1724 = vmatprep.mubr.msk.f32.mxu0 %vm2384_vm0, %v2382_v47  ;;  %2017 = vmatpush3.bf16.msra.mxu0 %v2313_v20 }
 0x379   :  { %2018 = vmatprep.subr.bf16.mxu0 %v2383_v48 }
 0x37c   :  { %2020 = vmatpush3.bf16.msra.mxu0 %v2314_v22 }
 0x37d   :  { %2021 = vmatprep.subr.bf16.mxu0 %v2383_v48 }
 0x380   :  { %2023 = vmatpush3.bf16.msra.mxu0 %v2315_v40 }
 0x381   :  { %2024 = vmatprep.subr.bf16.mxu0 %v2383_v48 }
 0x384   :  { %2026 = vmatpush3.bf16.msra.mxu0 %v2316_v42 }
 0x385   :  { %2027 = vmatprep.subr.bf16.mxu0 %v2383_v48 }
 0x388   :  { %2029 = vmatpush3.bf16.msra.mxu0 %v2317_v13 }
 0x389   :  { %2030 = vmatprep.subr.bf16.mxu0 %v2383_v48 }
 0x38c   :  { %2032 = vmatpush3.bf16.msra.mxu0 %v2318_v43 }
 0x38d   :  { %2033 = vmatprep.subr.bf16.mxu0 %v2383_v48 }
 0x390   :  { %2035 = vmatpush3.bf16.msra.mxu0 %v2319_v44 }
 0x391   :  { %2036 = vmatprep.subr.bf16.mxu0 %v2383_v48 }
 0x394   :  { %2038 = vmatpush3.bf16.msra.mxu0 %v2320_v46 }
 0x44a   :  { %v995_v10 = vpop.f32.mrb[6].mxu0 }
 0x44b   :  { %v996_v25 = vadd.f32 %v995_v10, %v924_v19  ;;  %v997_v27 = vpop.f32.mrb[7].mxu0 }
 0x44c   :  { %v998_v29 = vadd.f32 %v997_v27, %v928_v26 }
 0x44d   :  { %1648 = vmatpush3.xpose.msra.mxu1 %v996_v25 }
 0x44e   :  { %1652 = vmatprep.subr.mxu1 %v2382_v47 }
 0x450   :  { %1650 = vmatmul.mubr.f32.vlgmr.msra.gmra.mrb[6].mxu1 %v568_v28  ;;  %v1339_v28 = vsub.s32 4, %v2534_v53 }
 0x451   :  { %1653 = vmatpush3.msra.mxu1 %v998_v29  ;;  %1654 = vmatprep.mubr.msk.f32.mxu1 %vm2384_vm0, %v2382_v47 }
 0x452   :  { %1991 = vmatprep.subr.bf16.mxu1 %v2383_v48  ;;  %v1340_v29 = vrot.slane %v2540_v55, %v1339_v28 }
 0x523   :  { %v1067_v31 = vpop.f32.mrb[6].mxu1 }
 0x524   :  { %v1651_v32 = vpop.f32.mrb[7].mxu1  ;;  %v1073_v24 = vsel %vm1072_vm2, %v1067_v31, -inf }
 0x525   :  { %1074 = vmax.xlane.f32.xlu0 %v1073_v24 }
 0x5b2   :  { %v1075_v35 = vpop.xlane.xlu0 %1074 }
 0x5b3   :  { %v1076_v36 = vmax.f32 %v1071_v34, %v1075_v35 }
 0x5b5   :  { %v1077_v37 = vsub.f32 %v1071_v34, %v1076_v36  ;;  %1178 = vst.msk [vmem:[#allocation5] sm:$0xff] %vm571_vm1, %v1076_v36  ;;  %1082 = vperm.xlu0 %2183, %v1076_v36   ;;  %v1431_v34 = vsub.s32 5, %v2534_v53 }
 0x5b7   :  { %v1078_v60 = vmul.f32 1.442695, %v1077_v37 }
 0x634   :  { %v1083_v38 = vpop.permute.xlu0 %1082 }
 0x635   :  { %v1085_v49 = vsub.f32 %v1067_v31, %v1083_v38 }
 0x637   :  { %v1086_v50 = vmul.f32 1.442695, %v1085_v49  ;;  %v1432_v49 = vrot.slane %v2540_v55, %v1431_v34 }
 0x639   :  { %2337 = vpow2.f32 %v1086_v50 }
 0x63a   :  { %2339 = vpow2.f32 %v1078_v60 }
 0x643   :  { %v2338_v52 = vpop.eup %2337 }
 0x644   :  { %1655 = vmatmul.mubr.msk.f32.vlgmr.msra.gmra.mrb[8].mxu1 %vm1072_vm2, %v2338_v52  ;;  %v1090_v54 = vsel %vm1072_vm2, %v2338_v52, 0.0  ;;  %v2340_v15 = vpop.eup %2339 }
 0x645   :  { %1993 = vmatpush3.bf16.msra.mxu1 %v2305_v51  ;;  %1091 = vadd.xlane.f32.xlu1 %v1090_v54  ;;  %v1089_v41 = vmul.f32 %v2340_v15, %v1088_v23 }
 0x646   :  { %1994 = vmatprep.subr.bf16.mxu1 %v2383_v48  ;;  %1689 = vmatprep.mubr.msk.f32.mxu1 %vm2384_vm0, %v2382_v47  ;;  %v2311_v47 = vld [vmem:[#allocation8 + $0x200] ss:$40 sps:$4 sm:$0xff]  }
 0x649   :  { %1996 = vmatpush3.bf16.msra.mxu1 %v2306_v59 }
 0x64a   :  { %1997 = vmatprep.subr.bf16.mxu1 %v2383_v48 }
 0x64d   :  { %1999 = vmatpush3.bf16.msra.mxu1 %v2307_v61 }
 0x64e   :  { %2000 = vmatprep.subr.bf16.mxu1 %v2383_v48 }
 0x651   :  { %2002 = vmatpush3.bf16.msra.mxu1 %v2308_v62 }
 0x652   :  { %2003 = vmatprep.subr.bf16.mxu1 %v2383_v48 }
 0x655   :  { %2005 = vmatpush3.bf16.msra.mxu1 %v2309_v63 }
 0x656   :  { %1099 = vperm.xlu1 %2184, %v2340_v15   ;;  %2006 = vmatprep.subr.bf16.mxu1 %v2383_v48 }
 0x659   :  { %2008 = vmatpush3.bf16.msra.mxu1 %v2310_v16 }
 0x65a   :  { %2009 = vmatprep.subr.bf16.mxu1 %v2383_v48 }
 0x65d   :  { %2011 = vmatpush3.bf16.msra.mxu1 %v2311_v47 }
 0x65e   :  { %2012 = vmatprep.subr.bf16.mxu1 %v2383_v48 }
 0x661   :  { %2014 = vmatpush3.bf16.msra.mxu1 %v2312_v18 }
 0x664   :  { %1690 = vmatmul.mubr.f32.vlgmr.msra.gmra.mrb[10].mxu1 %v2683_v58 }
 0x6d2   :  { %v1092_v56 = vpop.xlane.xlu1 %1091 }
 0x6d3   :  { %v1093_v9 = vadd.f32 %v1092_v56, %v1089_v41 }
 0x6d5   :  { %1095 = vst.msk [vmem:[#allocation6] sm:$0xff] %vm571_vm1, %v1093_v9 }
 0x6d6   :  { %v1100_v17 = vpop.permute.xlu1 %1099 }
 0x6d7   :  { %v1102_v19 = vmul.f32 0.0, %v1100_v17 }
 0x6dc   :  { %v1183_v14 = vld [vmem:[#allocation6] sm:$0xff] }
 0x6dd   :  { %2341 = vrcp.f32 %v1183_v14 }
 0x6de   :  { %2343 = vtanh.f32 %v1413_v39 }
 0x6e7   :  { %v2342_v45 = vpop.eup %2341 }
 0x6e8   :  { %1187 = vperm.xlu1 %2184, %v2342_v45   ;;  %v2344_v0 = vpop.eup %2343 }
 0x6e9   :  { %v1421_v1 = vsub.f32 1.0, %v2344_v0 }
 0x6ec   :  { %1417 = vperm.xlu1 %2184, %v2344_v0  }
 0x6f0   :  { %1424 = vperm.xlu1 %2184, %v1421_v1  }
 0x717   :  { %v1172_v2 = vpop.f32.mrb[8].mxu1 }
 0x718   :  { %v1656_v3 = vpop.f32.mrb[9].mxu1  ;;  %v1176_v21 = vadd.f32 %v1172_v2, %v1102_v19 }
 0x737   :  { %v1294_v4 = vpop.f32.mrb[10].mxu1 }
 0x738   :  { %v1691_v5 = vpop.f32.mrb[11].mxu1  ;;  %v1295_v8 = vadd.f32 %v1294_v4, %v1227_v7 }
 0x73a   :  { %v1451_v11 = vmul.f32 -1.442695, %v1295_v8 }
 0x73c   :  { %2345 = vpow2.f32 %v1451_v11 }
 0x746   :  { %v2346_v48 = vpop.eup %2345 }
 0x747   :  { %v1301_v12 = vadd.f32 1.0, %v2346_v48 }
 0x749   :  { %2347 = vrcp.f32 %v1301_v12 }
 0x753   :  { %v2348_v26 = vpop.eup %2347 }
 0x767   :  { %v1188_v10 = vpop.permute.xlu1 %1187 }
 0x768   :  { %v1190_v25 = vmul.f32 %v1188_v10, %v1176_v21 }
 0x76a   :  { %v1304_v27 = vmul.f32 %v2348_v26, %v1190_v25 }
 0x76b   :  { %v1418_v33 = vpop.permute.xlu1 %1417 }
 0x76c   :  { %1725 = vmatmul.mubr.f32.vlgmr.msra.gmra.mrb[8].mxu0 %v1304_v27 }
 0x76f   :  { %v1425_v35 = vpop.permute.xlu1 %1424 }
 0x770   :  { %v1427_v37 = vmul.f32 %v1425_v35, %v2683_v58 }
 0x83f   :  { %v1407_v30 = vpop.f32.mrb[8].mxu0 }
 0x840   :  { %v1408_v31 = vadd.f32 %v1407_v30, %v1340_v29  ;;  %v1726_v32 = vpop.f32.mrb[9].mxu0 }
 0x842   :  { %v1411_v24 = vadd.f32 %v1408_v31, %v2683_v58 }
 0x844   :  { %2349 = vtanh.f32 %v1411_v24 }
 0x84e   :  { %v2350_v36 = vpop.eup %2349 }
 0x84f   :  { %v1420_v38 = vmul.f32 %v2350_v36, %v1418_v33 }
 0x851   :  { %v1428_v50 = vadd.f32 %v1427_v37, %v1420_v38 }
 0x853   :  { %v1433_v51 = vmul.f32 %v1432_v49, %v1428_v50 }
 0x855   :  { %1434 = vadd.xlane.f32.xlu1 %v1433_v51 }
 0x8e2   :  { %v1435_v52 = vpop.xlane.xlu1 %1434 }
 0x8e3   :  { %v1452_v54 = vmul.f32 -1.442695, %v1435_v52 }
 0x8e5   :  { %2351 = vpow2.f32 %v1452_v54 }
 0x8ef   :  { %v2352_v59 = vpop.eup %2351 }
 0x8f0   :  { %v1439_v60 = vadd.f32 1.0, %v2352_v59 }
 0x8f2   :  { %2353 = vrcp.f32 %v1439_v60 }
 0x8fc   :  { %v2354_v61 = vpop.eup %2353 }
 0x8fd   :  { %1442 = vst [vmem:[%s2709_s4] sm:$0xff] %v2354_v61 }
 0x8fe   :  { %1447 = vsyncpa [#allocation9], 1 }

</bundles_post_ra>
